<compile_context>
chip_gen: v7x
topology: tpu7x:2x2x1
jax: 0.10.0
libtpu: 0.0.40
codegen_flags: <defaults>
</compile_context>

<pallas_src>
import jax
import jax.numpy as jnp
from jax.experimental import pallas as pl
from jax.experimental.pallas import tpu as pltpu

EPSILON = 1e-7
_NUM_PARTIALS = 2          # per-core partial accumulators (v7x has 2 TCs)
_SCORE_ROW_TILE = 128      # row tile of H0^T in the score kernel


def _round_up(x, m):
    return ((x + m - 1) // m) * m


def _vmem_budget_bytes():
    """Generation-aware VMEM budget (~70% of capacity), conservative fallback."""
    cap = 64 * 1024 * 1024  # safe fallback (v7x per-TC VMEM)
    try:
        info = pltpu.get_tpu_info()
        cap = int(getattr(info, "vmem_capacity_bytes", cap))
    except Exception:
        pass
    return int(cap * 0.70)


def _pick_batch_tile(batch, d_pad, itemsize, budget_bytes, target_rows=None):
    """Largest multiple-of-8 batch tile that fits the VMEM budget."""
    if target_rows is not None:
        tb = _round_up(max(int(target_rows), 8), 8)
    else:
        # accumulators (x2 safety for buffering) + slack, then 2 inputs x 2 bufs.
        acc_bytes = 2 * (3 * d_pad * d_pad + 2 * 8 * d_pad) * 4
        avail = budget_bytes - acc_bytes - (4 << 20)
        tb = avail // (4 * d_pad * itemsize)
        tb = max(8, min(int(tb), 8192))
        tb = (tb // 8) * 8
        # TODO(synk): for very large D (>= ~1.5-2K on v7x) the (D,D) f32
        # accumulators themselves should be tiled over (Di, Dj) output blocks
        # with the batch axis innermost; not implemented here.
    tb = min(tb, _round_up(batch, 8))
    return max(tb, 8)


# ---------------------------------------------------------------------------
# Kernel 1: per-core accumulation of S00, S01, S11 and the column sums.
# Grid = (num_partials [parallel], steps_per_partial [arbitrary/reduction]).
# ---------------------------------------------------------------------------
def _cov_kernel(x_ref, y_ref, s00_ref, s01_ref, s11_ref, xsum_ref, ysum_ref):
    step = pl.program_id(1)

    @pl.when(step == 0)
    def _init():
        s00_ref[...] = jnp.zeros_like(s00_ref)
        s01_ref[...] = jnp.zeros_like(s01_ref)
        s11_ref[...] = jnp.zeros_like(s11_ref)
        xsum_ref[...] = jnp.zeros_like(xsum_ref)
        ysum_ref[...] = jnp.zeros_like(ysum_ref)

    x = x_ref[...]
    y = y_ref[...]
    # Contract the batch (sublane) axis of both operands: A^T B on the MXU,
    # f32 accumulation via preferred_element_type.
    ct = (((0,), (0,)), ((), ()))
    s00_ref[...] += jax.lax.dot_general(x, x, ct, preferred_element_type=jnp.float32)
    s01_ref[...] += jax.lax.dot_general(x, y, ct, preferred_element_type=jnp.float32)
    s11_ref[...] += jax.lax.dot_general(y, y, ct, preferred_element_type=jnp.float32)

    # Column sums on the MXU (ones @ X) instead of a VPU/XLU axis-0 reduce.
    # 8 identical rows cost the same MXU pass and keep the store sublane-aligned.
    ones = jnp.ones((8, x.shape[0]), dtype=x.dtype)
    cn = (((1,), (0,)), ((), ()))
    xsum_ref[...] += jax.lax.dot_general(ones, x, cn, preferred_element_type=jnp.float32)
    ysum_ref[...] += jax.lax.dot_general(ones, y, cn, preferred_element_type=jnp.float32)


# ---------------------------------------------------------------------------
# Kernel 2: row-tiled VAMP-2 score partials:  per tile  sum((H0^T C01 H1)^2).
# H0 is pre-transposed in the wrapper so both matmuls are plain row-major.
# ---------------------------------------------------------------------------
def _score_kernel(h0t_ref, c01_ref, h1_ref, psum_ref):
    t = jnp.dot(h0t_ref[...], c01_ref[...], preferred_element_type=jnp.float32)
    m = jnp.dot(t, h1_ref[...], preferred_element_type=jnp.float32)
    ps = jnp.sum(m * m, axis=0, keepdims=True)              # (1, D_pad) per-lane
    psum_ref[...] = pl.broadcast_to(ps, (8, ps.shape[1]))    # sublane-aligned store
    # TODO(synk): for very large D the full (D,D) C01/H1 blocks should be
    # K-tiled as well (or the score demoted to plain XLA); not needed here.


# ---------------------------------------------------------------------------
# Plain-JAX glue: truncated 1/sqrt eigen-factor H = U * diag(1/sqrt(lambda)).
# ---------------------------------------------------------------------------
def _inv_sqrt_half(c, epsilon=EPSILON):
    # TODO(synk): eigh has no Pallas equivalent; runs as a regular XLA op.
    eigval, eigvec = jnp.linalg.eigh(c)
    keep = eigval > epsilon
    safe = jnp.where(keep, eigval, 1.0)
    w = jnp.where(keep, 1.0 / jnp.sqrt(safe), 0.0)  # dropped modes contribute 0
    return eigvec * w[None, :]


# ---------------------------------------------------------------------------
# Wrapper reproducing VAMPLoss.forward for the default configuration.
# ---------------------------------------------------------------------------
def vamp_loss(X, Y, epsilon=EPSILON, block_rows=None):
    B, D = X.shape
    d_pad = _round_up(max(D, 128), 128)
    budget = _vmem_budget_bytes()
    itemsize = jnp.dtype(X.dtype).itemsize

    tb = _pick_batch_tile(B, d_pad, itemsize, budget, block_rows)
    steps = pl.cdiv(B, tb)
    num_partials = _NUM_PARTIALS if steps >= _NUM_PARTIALS else 1
    steps_per_partial = pl.cdiv(steps, num_partials)
    b_pad = num_partials * steps_per_partial * tb

    # Zero-pad batch and feature dims: zero rows/cols contribute nothing to the
    # raw moments or column sums, and the mean correction uses the true B.
    if b_pad != B or d_pad != D:
        Xp = jnp.pad(X, ((0, b_pad - B), (0, d_pad - D)))
        Yp = jnp.pad(Y, ((0, b_pad - B), (0, d_pad - D)))
    else:
        Xp, Yp = X, Y

    in_map = lambda c, i, spc=steps_per_partial: (c * spc + i, 0)
    acc_map = lambda c, i: (c, 0, 0)

    s00_p, s01_p, s11_p, xs_p, ys_p = pl.pallas_call(
        _cov_kernel,
        grid=(num_partials, steps_per_partial),
        in_specs=[
            pl.BlockSpec((tb, d_pad), in_map),
            pl.BlockSpec((tb, d_pad), in_map),
        ],
        out_specs=(
            pl.BlockSpec((None, d_pad, d_pad), acc_map),
            pl.BlockSpec((None, d_pad, d_pad), acc_map),
            pl.BlockSpec((None, d_pad, d_pad), acc_map),
            pl.BlockSpec((None, 8, d_pad), acc_map),
            pl.BlockSpec((None, 8, d_pad), acc_map),
        ),
        out_shape=(
            jax.ShapeDtypeStruct((num_partials, d_pad, d_pad), jnp.float32),
            jax.ShapeDtypeStruct((num_partials, d_pad, d_pad), jnp.float32),
            jax.ShapeDtypeStruct((num_partials, d_pad, d_pad), jnp.float32),
            jax.ShapeDtypeStruct((num_partials, 8, d_pad), jnp.float32),
            jax.ShapeDtypeStruct((num_partials, 8, d_pad), jnp.float32),
        ),
        compiler_params=pltpu.CompilerParams(
            dimension_semantics=("parallel", "arbitrary"),
            vmem_limit_bytes=budget),
    )(Xp, Yp)

    # Combine per-core partials (tiny O(D^2) XLA ops).
    s00 = jnp.sum(s00_p, axis=0)
    s01 = jnp.sum(s01_p, axis=0)
    s11 = jnp.sum(s11_p, axis=0)
    xsum = jnp.sum(xs_p, axis=0)[0:1, :]    # all 8 rows identical -> take row 0
    ysum = jnp.sum(ys_p, axis=0)[0:1, :]

    # Algebraic mean correction with the FULL batch size.
    # NOTE: raw-moment accumulation assumes feature means are not huge relative
    # to the variances (same conditioning requirement as the eigh that follows).
    inv_b = 1.0 / B
    inv_bm1 = 1.0 / (B - 1)
    c00p = (s00 - jnp.dot(xsum.T, xsum) * inv_b) * inv_bm1
    c01p = (s01 - jnp.dot(xsum.T, ysum) * inv_b) * inv_bm1
    c11p = (s11 - jnp.dot(ysum.T, ysum) * inv_b) * inv_bm1

    # Eigendecompositions on the un-padded D x D blocks.
    h0 = _inv_sqrt_half(c00p[:D, :D], epsilon)   # (D, D)
    h1 = _inv_sqrt_half(c11p[:D, :D], epsilon)

    # Re-embed into the lane-padded size (padded rows/cols are zero and add 0
    # to the Frobenius norm); pre-transpose H0 here (free XLA op) so the score
    # kernel needs no in-kernel transpose.
    h0t = jnp.pad(h0.T, ((0, d_pad - D), (0, d_pad - D))).astype(jnp.float32)
    h1p = jnp.pad(h1, ((0, d_pad - D), (0, d_pad - D))).astype(jnp.float32)
    c01_pad = c01p.astype(jnp.float32)            # already (d_pad, d_pad)

    n_tiles = d_pad // _SCORE_ROW_TILE
    psum = pl.pallas_call(
        _score_kernel,
        grid=(n_tiles,),
        in_specs=[
            pl.BlockSpec((_SCORE_ROW_TILE, d_pad), lambda i: (i, 0)),
            pl.BlockSpec((d_pad, d_pad), lambda i: (0, 0)),
            pl.BlockSpec((d_pad, d_pad), lambda i: (0, 0)),
        ],
        out_specs=pl.BlockSpec((None, 8, d_pad), lambda i: (i, 0, 0)),
        out_shape=jax.ShapeDtypeStruct((n_tiles, 8, d_pad), jnp.float32),
        compiler_params=pltpu.CompilerParams(
            dimension_semantics=("parallel",),
            vmem_limit_bytes=budget),
    )(h0t, c01_pad, h1p)

    score = jnp.sum(psum[:, 0, :])   # rows 1..7 are duplicates of row 0
    # TODO(synk): r==1 (nuclear norm), rank truncation (svdvals) and the
    # reversible path (cholesky/inv/eigvalsh) need dense factorizations with no
    # Pallas equivalent; only the default r=2 path is implemented here.
    return -score


# ---------------------------------------------------------------------------
# Pure-JAX reference (mirrors the PyTorch module, default config).
# ---------------------------------------------------------------------------
def _inv_sqrt_trunc_ref(c, epsilon=EPSILON):
    eigval, eigvec = jnp.linalg.eigh(c)
    keep = eigval > epsilon
    safe = jnp.where(keep, eigval, 1.0)
    w = jnp.where(keep, 1.0 / jnp.sqrt(safe), 0.0)
    return (eigvec * w[None, :]) @ eigvec.T


def _vamp_loss_ref(X, Y, epsilon=EPSILON):
    B = X.shape[0]
    hp = jax.lax.Precision.HIGHEST
    Xc = X - X.mean(0, keepdims=True)
    Yc = Y - Y.mean(0, keepdims=True)
    c01 = jnp.dot(Xc.T, Yc, precision=hp) / (B - 1)
    c00 = jnp.dot(Xc.T, Xc, precision=hp) / (B - 1)
    c11 = jnp.dot(Yc.T, Yc, precision=hp) / (B - 1)
    a0 = _inv_sqrt_trunc_ref(c00, epsilon)
    a1 = _inv_sqrt_trunc_ref(c11, epsilon)
    vm = jnp.dot(jnp.dot(a0, c01, precision=hp), a1, precision=hp)
    return -jnp.sum(vm * vm)


if __name__ == "__main__":
    key = jax.random.PRNGKey(0)
    kx, ky = jax.random.split(key)
    batch, dim = 256, 32  # batch >> dim so the covariances are well-conditioned
    X = jax.random.normal(kx, (batch, dim), dtype=jnp.float32)
    Y = jax.random.normal(ky, (batch, dim), dtype=jnp.float32)

    # block_rows=64 -> 4 batch tiles, 2 per-core partials -> grid (2, 2):
    # exercises the parallel axis, tiled accumulation and D padding (32 -> 128).
    loss = jax.block_until_ready(vamp_loss(X, Y, block_rows=64))
    ref = jax.block_until_ready(_vamp_loss_ref(X, Y))

    assert jnp.isfinite(loss), "non-finite loss"
    assert jnp.allclose(loss, ref, rtol=5e-3, atol=5e-3), (loss, ref)
    print("KERNEL_OK")
</pallas_src>

<mosaic_0001>
module attributes {stable_mosaic.version = 11 : i64} {
  func.func @_cov_kernel(%arg0: i32, %arg1: i32, %arg2: memref<64x128xf32, #tpu.memory_space<vmem>>, %arg3: memref<64x128xf32, #tpu.memory_space<vmem>>, %arg4: memref<1x128x128xf32, #tpu.memory_space<vmem>>, %arg5: memref<1x128x128xf32, #tpu.memory_space<vmem>>, %arg6: memref<1x128x128xf32, #tpu.memory_space<vmem>>, %arg7: memref<1x8x128xf32, #tpu.memory_space<vmem>>, %arg8: memref<1x8x128xf32, #tpu.memory_space<vmem>>) attributes {dimension_semantics = [#tpu.dimension_semantics<parallel>, #tpu.dimension_semantics<arbitrary>], iteration_bounds = array<i64: 2, 2>, scalar_prefetch = 0 : i64, scratch_operands = 0 : i64, tpu.core_type = #tpu.core_type<tc>, window_params = [{transform_indices = @transform_0, window_bounds = array<i64: 64, 128>}, {transform_indices = @transform_1, window_bounds = array<i64: 64, 128>}, {transform_indices = @transform_2, window_bounds = array<i64: 1, 128, 128>}, {transform_indices = @transform_3, window_bounds = array<i64: 1, 128, 128>}, {transform_indices = @transform_4, window_bounds = array<i64: 1, 128, 128>}, {transform_indices = @transform_5, window_bounds = array<i64: 1, 8, 128>}, {transform_indices = @transform_6, window_bounds = array<i64: 1, 8, 128>}]} {
    %c0_i32 = arith.constant 0 : i32
    %0 = arith.cmpi eq, %arg1, %c0_i32 : i32
    %1 = arith.extui %0 : i1 to i32
    %c0_i32_0 = arith.constant 0 : i32
    %2 = arith.cmpi ne, %1, %c0_i32_0 : i32
    scf.if %2 {
      %cst_39 = arith.constant 0.000000e+00 : f32
      %41 = vector.broadcast %cst_39 : f32 to vector<128x128xf32>
      %c0_40 = arith.constant 0 : index
      %c0_41 = arith.constant 0 : index
      %c0_42 = arith.constant 0 : index
      %42 = vector.load %arg4[%c0_40, %c0_41, %c0_42] : memref<1x128x128xf32, #tpu.memory_space<vmem>>, vector<1x128x128xf32>
      %43 = vector.shape_cast %42 : vector<1x128x128xf32> to vector<128x128xf32>
      %44 = vector.shape_cast %41 : vector<128x128xf32> to vector<1x128x128xf32>
      tpu.vector_store %arg4[%c0_40, %c0_41, %c0_42], %44 {strides = array<i32>} : memref<1x128x128xf32, #tpu.memory_space<vmem>>, vector<1x128x128xf32>,
      %cst_43 = arith.constant 0.000000e+00 : f32
      %45 = vector.broadcast %cst_43 : f32 to vector<128x128xf32>
      %c0_44 = arith.constant 0 : index
      %c0_45 = arith.constant 0 : index
      %c0_46 = arith.constant 0 : index
      %46 = vector.load %arg5[%c0_44, %c0_45, %c0_46] : memref<1x128x128xf32, #tpu.memory_space<vmem>>, vector<1x128x128xf32>
      %47 = vector.shape_cast %46 : vector<1x128x128xf32> to vector<128x128xf32>
      %48 = vector.shape_cast %45 : vector<128x128xf32> to vector<1x128x128xf32>
      tpu.vector_store %arg5[%c0_44, %c0_45, %c0_46], %48 {strides = array<i32>} : memref<1x128x128xf32, #tpu.memory_space<vmem>>, vector<1x128x128xf32>,
      %cst_47 = arith.constant 0.000000e+00 : f32
      %49 = vector.broadcast %cst_47 : f32 to vector<128x128xf32>
      %c0_48 = arith.constant 0 : index
      %c0_49 = arith.constant 0 : index
      %c0_50 = arith.constant 0 : index
      %50 = vector.load %arg6[%c0_48, %c0_49, %c0_50] : memref<1x128x128xf32, #tpu.memory_space<vmem>>, vector<1x128x128xf32>
      %51 = vector.shape_cast %50 : vector<1x128x128xf32> to vector<128x128xf32>
      %52 = vector.shape_cast %49 : vector<128x128xf32> to vector<1x128x128xf32>
      tpu.vector_store %arg6[%c0_48, %c0_49, %c0_50], %52 {strides = array<i32>} : memref<1x128x128xf32, #tpu.memory_space<vmem>>, vector<1x128x128xf32>,
      %cst_51 = arith.constant 0.000000e+00 : f32
      %53 = vector.broadcast %cst_51 : f32 to vector<8x128xf32>
      %c0_52 = arith.constant 0 : index
      %c0_53 = arith.constant 0 : index
      %c0_54 = arith.constant 0 : index
      %54 = vector.load %arg7[%c0_52, %c0_53, %c0_54] : memref<1x8x128xf32, #tpu.memory_space<vmem>>, vector<1x8x128xf32>
      %55 = vector.shape_cast %54 : vector<1x8x128xf32> to vector<8x128xf32>
      %56 = vector.shape_cast %53 : vector<8x128xf32> to vector<1x8x128xf32>
      tpu.vector_store %arg7[%c0_52, %c0_53, %c0_54], %56 {strides = array<i32>} : memref<1x8x128xf32, #tpu.memory_space<vmem>>, vector<1x8x128xf32>,
      %cst_55 = arith.constant 0.000000e+00 : f32
      %57 = vector.broadcast %cst_55 : f32 to vector<8x128xf32>
      %c0_56 = arith.constant 0 : index
      %c0_57 = arith.constant 0 : index
      %c0_58 = arith.constant 0 : index
      %58 = vector.load %arg8[%c0_56, %c0_57, %c0_58] : memref<1x8x128xf32, #tpu.memory_space<vmem>>, vector<1x8x128xf32>
      %59 = vector.shape_cast %58 : vector<1x8x128xf32> to vector<8x128xf32>
      %60 = vector.shape_cast %57 : vector<8x128xf32> to vector<1x8x128xf32>
      tpu.vector_store %arg8[%c0_56, %c0_57, %c0_58], %60 {strides = array<i32>} : memref<1x8x128xf32, #tpu.memory_space<vmem>>, vector<1x8x128xf32>,
    } else {
    }
    %c0 = arith.constant 0 : index
    %c0_1 = arith.constant 0 : index
    %3 = vector.load %arg2[%c0, %c0_1] : memref<64x128xf32, #tpu.memory_space<vmem>>, vector<64x128xf32>
    %c0_2 = arith.constant 0 : index
    %c0_3 = arith.constant 0 : index
    %4 = vector.load %arg3[%c0_2, %c0_3] : memref<64x128xf32, #tpu.memory_space<vmem>>, vector<64x128xf32>
    %c0_4 = arith.constant 0 : index
    %c0_5 = arith.constant 0 : index
    %c0_6 = arith.constant 0 : index
    %5 = vector.load %arg4[%c0_4, %c0_5, %c0_6] : memref<1x128x128xf32, #tpu.memory_space<vmem>>, vector<1x128x128xf32>
    %6 = vector.shape_cast %5 : vector<1x128x128xf32> to vector<128x128xf32>
    %cst = arith.constant dense<0.000000e+00> : vector<128x128xf32>
    %7 = tpu.matmul %3, %3, %cst {dimension_numbers = #tpu.dot_dimension_numbers<[0], [0], [1], [1], [0, 1, 1, 1], [], []>} : vector<64x128xf32>, vector<64x128xf32>, vector<128x128xf32> -> vector<128x128xf32>
    %8 = arith.addf %6, %7 : vector<128x128xf32>
    %c0_7 = arith.constant 0 : index
    %c0_8 = arith.constant 0 : index
    %c0_9 = arith.constant 0 : index
    %9 = vector.load %arg4[%c0_7, %c0_8, %c0_9] : memref<1x128x128xf32, #tpu.memory_space<vmem>>, vector<1x128x128xf32>
    %10 = vector.shape_cast %9 : vector<1x128x128xf32> to vector<128x128xf32>
    %11 = vector.shape_cast %8 : vector<128x128xf32> to vector<1x128x128xf32>
    tpu.vector_store %arg4[%c0_7, %c0_8, %c0_9], %11 {strides = array<i32>} : memref<1x128x128xf32, #tpu.memory_space<vmem>>, vector<1x128x128xf32>,
    %c0_10 = arith.constant 0 : index
    %c0_11 = arith.constant 0 : index
    %c0_12 = arith.constant 0 : index
    %12 = vector.load %arg5[%c0_10, %c0_11, %c0_12] : memref<1x128x128xf32, #tpu.memory_space<vmem>>, vector<1x128x128xf32>
    %13 = vector.shape_cast %12 : vector<1x128x128xf32> to vector<128x128xf32>
    %cst_13 = arith.constant dense<0.000000e+00> : vector<128x128xf32>
    %14 = tpu.matmul %3, %4, %cst_13 {dimension_numbers = #tpu.dot_dimension_numbers<[0], [0], [1], [1], [0, 1, 1, 1], [], []>} : vector<64x128xf32>, vector<64x128xf32>, vector<128x128xf32> -> vector<128x128xf32>
    %15 = arith.addf %13, %14 : vector<128x128xf32>
    %c0_14 = arith.constant 0 : index
    %c0_15 = arith.constant 0 : index
    %c0_16 = arith.constant 0 : index
    %16 = vector.load %arg5[%c0_14, %c0_15, %c0_16] : memref<1x128x128xf32, #tpu.memory_space<vmem>>, vector<1x128x128xf32>
    %17 = vector.shape_cast %16 : vector<1x128x128xf32> to vector<128x128xf32>
    %18 = vector.shape_cast %15 : vector<128x128xf32> to vector<1x128x128xf32>
    tpu.vector_store %arg5[%c0_14, %c0_15, %c0_16], %18 {strides = array<i32>} : memref<1x128x128xf32, #tpu.memory_space<vmem>>, vector<1x128x128xf32>,
    %c0_17 = arith.constant 0 : index
    %c0_18 = arith.constant 0 : index
    %c0_19 = arith.constant 0 : index
    %19 = vector.load %arg6[%c0_17, %c0_18, %c0_19] : memref<1x128x128xf32, #tpu.memory_space<vmem>>, vector<1x128x128xf32>
    %20 = vector.shape_cast %19 : vector<1x128x128xf32> to vector<128x128xf32>
    %cst_20 = arith.constant dense<0.000000e+00> : vector<128x128xf32>
    %21 = tpu.matmul %4, %4, %cst_20 {dimension_numbers = #tpu.dot_dimension_numbers<[0], [0], [1], [1], [0, 1, 1, 1], [], []>} : vector<64x128xf32>, vector<64x128xf32>, vector<128x128xf32> -> vector<128x128xf32>
    %22 = arith.addf %20, %21 : vector<128x128xf32>
    %c0_21 = arith.constant 0 : index
    %c0_22 = arith.constant 0 : index
    %c0_23 = arith.constant 0 : index
    %23 = vector.load %arg6[%c0_21, %c0_22, %c0_23] : memref<1x128x128xf32, #tpu.memory_space<vmem>>, vector<1x128x128xf32>
    %24 = vector.shape_cast %23 : vector<1x128x128xf32> to vector<128x128xf32>
    %25 = vector.shape_cast %22 : vector<128x128xf32> to vector<1x128x128xf32>
    tpu.vector_store %arg6[%c0_21, %c0_22, %c0_23], %25 {strides = array<i32>} : memref<1x128x128xf32, #tpu.memory_space<vmem>>, vector<1x128x128xf32>,
    %cst_24 = arith.constant 1.000000e+00 : f32
    %26 = vector.broadcast %cst_24 : f32 to vector<8x64xf32>
    %c0_25 = arith.constant 0 : index
    %c0_26 = arith.constant 0 : index
    %c0_27 = arith.constant 0 : index
    %27 = vector.load %arg7[%c0_25, %c0_26, %c0_27] : memref<1x8x128xf32, #tpu.memory_space<vmem>>, vector<1x8x128xf32>
    %28 = vector.shape_cast %27 : vector<1x8x128xf32> to vector<8x128xf32>
    %cst_28 = arith.constant dense<0.000000e+00> : vector<8x128xf32>
    %29 = tpu.matmul %26, %3, %cst_28 {dimension_numbers = #tpu.dot_dimension_numbers<[1], [0], [0], [1], [0, 0, 1, 1], [], []>} : vector<8x64xf32>, vector<64x128xf32>, vector<8x128xf32> -> vector<8x128xf32>
    %30 = arith.addf %28, %29 : vector<8x128xf32>
    %c0_29 = arith.constant 0 : index
    %c0_30 = arith.constant 0 : index
    %c0_31 = arith.constant 0 : index
    %31 = vector.load %arg7[%c0_29, %c0_30, %c0_31] : memref<1x8x128xf32, #tpu.memory_space<vmem>>, vector<1x8x128xf32>
    %32 = vector.shape_cast %31 : vector<1x8x128xf32> to vector<8x128xf32>
    %33 = vector.shape_cast %30 : vector<8x128xf32> to vector<1x8x128xf32>
    tpu.vector_store %arg7[%c0_29, %c0_30, %c0_31], %33 {strides = array<i32>} : memref<1x8x128xf32, #tpu.memory_space<vmem>>, vector<1x8x128xf32>,
    %c0_32 = arith.constant 0 : index
    %c0_33 = arith.constant 0 : index
    %c0_34 = arith.constant 0 : index
    %34 = vector.load %arg8[%c0_32, %c0_33, %c0_34] : memref<1x8x128xf32, #tpu.memory_space<vmem>>, vector<1x8x128xf32>
    %35 = vector.shape_cast %34 : vector<1x8x128xf32> to vector<8x128xf32>
    %cst_35 = arith.constant dense<0.000000e+00> : vector<8x128xf32>
    %36 = tpu.matmul %26, %4, %cst_35 {dimension_numbers = #tpu.dot_dimension_numbers<[1], [0], [0], [1], [0, 0, 1, 1], [], []>} : vector<8x64xf32>, vector<64x128xf32>, vector<8x128xf32> -> vector<8x128xf32>
    %37 = arith.addf %35, %36 : vector<8x128xf32>
    %c0_36 = arith.constant 0 : index
    %c0_37 = arith.constant 0 : index
    %c0_38 = arith.constant 0 : index
    %38 = vector.load %arg8[%c0_36, %c0_37, %c0_38] : memref<1x8x128xf32, #tpu.memory_space<vmem>>, vector<1x8x128xf32>
    %39 = vector.shape_cast %38 : vector<1x8x128xf32> to vector<8x128xf32>
    %40 = vector.shape_cast %37 : vector<8x128xf32> to vector<1x8x128xf32>
    tpu.vector_store %arg8[%c0_36, %c0_37, %c0_38], %40 {strides = array<i32>} : memref<1x8x128xf32, #tpu.memory_space<vmem>>, vector<1x8x128xf32>,
    return
  }
  func.func @transform_0(%arg0: i32, %arg1: i32) -> (i32, i32) {
    %c2_i32 = arith.constant 2 : i32
    %0 = arith.muli %arg0, %c2_i32 : i32
    %1 = arith.addi %0, %arg1 : i32
    %c0_i32 = arith.constant 0 : i32
    %c0_i32_0 = arith.constant 0 : i32
    return %1, %c0_i32 : i32, i32
  }
  func.func @transform_1(%arg0: i32, %arg1: i32) -> (i32, i32) {
    %c2_i32 = arith.constant 2 : i32
    %0 = arith.muli %arg0, %c2_i32 : i32
    %1 = arith.addi %0, %arg1 : i32
    %c0_i32 = arith.constant 0 : i32
    %c0_i32_0 = arith.constant 0 : i32
    return %1, %c0_i32 : i32, i32
  }
  func.func @transform_2(%arg0: i32, %arg1: i32) -> (i32, i32, i32) {
    %c0_i32 = arith.constant 0 : i32
    %c0_i32_0 = arith.constant 0 : i32
    %c0_i32_1 = arith.constant 0 : i32
    return %arg0, %c0_i32, %c0_i32_0 : i32, i32, i32
  }
  func.func @transform_3(%arg0: i32, %arg1: i32) -> (i32, i32, i32) {
    %c0_i32 = arith.constant 0 : i32
    %c0_i32_0 = arith.constant 0 : i32
    %c0_i32_1 = arith.constant 0 : i32
    return %arg0, %c0_i32, %c0_i32_0 : i32, i32, i32
  }
  func.func @transform_4(%arg0: i32, %arg1: i32) -> (i32, i32, i32) {
    %c0_i32 = arith.constant 0 : i32
    %c0_i32_0 = arith.constant 0 : i32
    %c0_i32_1 = arith.constant 0 : i32
    return %arg0, %c0_i32, %c0_i32_0 : i32, i32, i32
  }
  func.func @transform_5(%arg0: i32, %arg1: i32) -> (i32, i32, i32) {
    %c0_i32 = arith.constant 0 : i32
    %c0_i32_0 = arith.constant 0 : i32
    %c0_i32_1 = arith.constant 0 : i32
    return %arg0, %c0_i32, %c0_i32_0 : i32, i32, i32
  }
  func.func @transform_6(%arg0: i32, %arg1: i32) -> (i32, i32, i32) {
    %c0_i32 = arith.constant 0 : i32
    %c0_i32_0 = arith.constant 0 : i32
    %c0_i32_1 = arith.constant 0 : i32
    return %arg0, %c0_i32, %c0_i32_0 : i32, i32, i32
  }
}

</mosaic_0001>

<bundles_post_ra>
// kernel: tpu_custom_call.1
= control target key start
LH: loop header
LB: loop body
LE: loop exit
PB: predicated region body
PF: predicated region fallthrough
CT: control target
= control target key end

     0   :  { %s3305_s0 = inlined_call_operand.hbm [shape: f32[256,128], index: 0, kind: input, shape index: {}]   ;;  %s3306_s1 = inlined_call_operand.hbm [shape: f32[256,128], index: 1, kind: input, shape index: {}]   ;;  %s3307_s2 = inlined_call_operand.hbm [shape: f32[2,128,128], index: 2, kind: output, shape index: {0}]   ;;  %s3308_s3 = inlined_call_operand.hbm [shape: f32[2,128,128], index: 3, kind: output, shape index: {1}]   ;;  %s3309_s4 = inlined_call_operand.hbm [shape: f32[2,128,128], index: 4, kind: output, shape index: {2}]   ;;  %s3310_s5 = inlined_call_operand.hbm [shape: f32[2,8,128], index: 5, kind: output, shape index: {3}]   ;;  %s3311_s6 = inlined_call_operand.hbm [shape: f32[2,8,128], index: 6, kind: output, shape index: {4}]  }
   0x1   :  { %3325 = sst [smem:[#allocation28_spill]] %s3305_s0 }
   0x2   :  { %3326 = sst [smem:[#allocation29_spill]] %s3306_s1 }
   0x3   :  { %3327 = sst [smem:[#allocation30_spill]] %s3309_s4 }
   0x4   :  { %12 = vsyncpa [#allocation3], 0 }
   0x5   :  { %14 = vsyncpa [#allocation3 + $0x1], 0 }
   0x6   :  { %15 = vsyncpa [#allocation6], 0 }
   0x7   :  { %17 = vsyncpa [#allocation6 + $0x1], 0 }
   0x8   :  { %18 = vsyncpa [#allocation4], 0 }
   0x9   :  { %20 = vsyncpa [#allocation4 + $0x1], 0 }
   0xa   :  { %21 = vsyncpa [#allocation9], 0 }
   0xb   :  { %23 = vsyncpa [#allocation9 + $0x1], 0 }
   0xc   :  { %24 = vsyncpa [#allocation12], 0 }
   0xd   :  { %26 = vsyncpa [#allocation12 + $0x1], 0  ;;  %s2569_s21 = smov 0   ;;  %s2571_s22 = smov 0  }
   0xe   :  { %s2573_s23 = smov 0   ;;  %s2575_s24 = smov 0  }
   0xf   :  { %s2577_s25 = smov 0   ;;  %s2579_s26 = smov 0  }
  0x10   :  { %s2581_s27 = smov 0   ;;  %s2583_s28 = smov 0  }
  0x11   :  { %s2585_s29 = smov 0   ;;  %s2587_s30 = smov 0  }
  0x12   :  { %s2589_s7 = smov 0  }
  0x13 LB: > { %3328 = sst [smem:[#allocation19_spill]] %s2484_s23  ;;  %s2623_s8 = sadd.s32 4294967295, %s2516_s7   ;;  %s2516_s7 = sphi %s2589_s7, %s32_s7   ;;  %s2512_s30 = sphi %s2587_s30, %s3367_s30   ;;  %s2508_s29 = sphi %s2585_s29, %s3366_s29   ;;  %s2504_s28 = sphi %s2583_s28, %s3365_s28   ;;  %s2500_s27 = sphi %s2581_s27, %s3364_s27   ;;  %s2496_s26 = sphi %s2579_s26, %s3363_s26   ;;  %s2492_s25 = sphi %s2577_s25, %s3362_s25   ;;  %s2488_s24 = sphi %s2575_s24, %s3361_s24   ;;  %s2484_s23 = sphi %s2573_s23, %s3360_s23   ;;  %s2480_s22 = sphi %s2571_s22, %s3369_s22   ;;  %s2476_s21 = sphi %s2569_s21, %s3368_s21  }
  0x14   : > { %3329 = sst [smem:[#allocation20_spill]] %s2492_s25  ;;  %s41_s10 = sadd.s32 1, %s2508_s29 }
  0x15   : > { %3330 = sst [smem:[#allocation21_spill]] %s2496_s26  ;;  %s44_s11 = sadd.s32 1, %s2512_s30 }
  0x16   : > { %3331 = sst [smem:[#allocation22_spill]] %s2508_s29  ;;  %p42_p0 = scmp.ge.s32.totalorder %s41_s10, 2 }
  0x17   : > { %3332 = sst [smem:[#allocation23_spill]] %s2512_s30  ;;  %s1661_s12 = sshll.u32 %s2512_s30, 1 }
  0x18   : > { %s2630_s13 = sadd.s32 %s2508_s29, %s1661_s12  ;;  %s55_s14 = sadd.s32 1, %s2496_s26 }
  0x19   : > { %s3371_s10 = smov (%p42_p0, %s41_s10), 0  ;;  %s3373_s11 = smov (!%p42_p0, %s44_s11), %s2512_s30 }
  0x1a   : > { %3333 = sst [smem:[#allocation24_spill]] %s3371_s10  ;;  %p62_p1 = scmp.ne.s32.totalorder %s2496_s26, %s2492_s25 }
  0x1b   : > { %p63_p2 = scmp.eq.s32.totalorder %s2516_s7, 0  ;;  %p46_p3 = scmp.ge.s32.totalorder %s3373_s11, 2 }
  0x1c   : > { %p68_p4 = scmp.ne.s32.totalorder %s2492_s25, %s2488_s24  ;;  %p69_p6 = scmp.eq.s32.totalorder %s2623_s8, 0 }
  0x1d   : > { %p2640_p5 = por %p63_p2, %p62_p1  ;;  %s3375_s11 = smov (%p46_p3, %s3373_s11), 0 }
  0x1e   : > { %3335 = sst [smem:[#allocation25_spill]] %s3375_s11  ;;  %p2647_p7 = por %p69_p6, %p68_p4 }
  0x1f   : > { %s111_s17 = sadd.s32 1, %s2484_s23  ;;  %s1662_s18 = sshll.u32 %s3375_s11, 1 }
  0x20   : > { %s3336_s16 = scalar_select %p2647_p7, 1, 0 }
  0x21   : > { %s108_s19 = ssub.s32 %s2512_s30, %s3375_s11  ;;  %s51_s20 = sadd.s32 %s1662_s18, %s3371_s10 }
  0x22   : > { %p109_p8 = scmp.eq.s32.totalorder %s108_s19, 0  ;;  %s52_s24 = ssub.s32 %s2630_s13, %s51_s20 }
  0x23   : > { %p121_p9 = scmp.ne.s32.totalorder %s2484_s23, %s2480_s22  ;;  %p53_p10 = scmp.eq.s32.totalorder %s52_s24, 0 }
  0x24   : > { %p122_p11 = scmp.eq.s32.totalorder %s2623_s8, 3  ;;  %p127_p13 = scmp.ne.s32.totalorder %s2480_s22, %s2476_s21 }
  0x25   : > { %s2661_s12 = scalar_select %p109_p8, %s2484_s23, %s111_s17  }
  0x26   : > { %s2664_s9 = scalar_select %p53_p10, %s2496_s26, %s55_s14  }
  0x27   : > { %3337 = sst [smem:[#allocation26_spill]] %s2661_s12  ;;  %p2666_p12 = por %p122_p11, %p121_p9 }
  0x28   : > { %3338 = sst [smem:[#allocation27_spill]] %s2664_s9  ;;  %s3340_s4 = sadd.s32 4294967294, %s2516_s7  }
  0x29   : > { %s3339_s29 = scalar_select %p2666_p12, 1, 0 }
  0x2a   : > { %p128_p0 = scmp.eq.s32.totalorder %s3340_s4, 3  ;;  %p2111_p1 = scmp.lt.s32.totalorder %s2516_s7, 4 }
  0x2b   : > { %s2676_s18 = sand.u32 1, %s2496_s26   ;;  %s3318_s14 = sshll.u32 %s2630_s13, 10 }
  0x2c   : > { %p2678_p2 = por %p128_p0, %p127_p13  ;;  %s3317_s17 = sshll.u32 %s2676_s18, 6 }
  0x2d   : > { %s3342_s0 = sld [smem:[#allocation28_spill]]  ;;  %s256_s4 = scalar_lea.vmem [#allocation2], %s3317_s17 }
  0x2e   : > { %s3341_s19 = scalar_select %p2678_p2, 1, 0 }
  0x2f   : > { %s265_s10 = sshll.u32 %s256_s4, 4  ;;  %p2695_p3 = pnand %p2111_p1, %p2640_p5  ;;  %s2699_s10 = int_to_ptr.vmem [resolvable:$true] %s265_s10 }
  0x31   : > { %p2212_p6 = pneg %p2695_p3 }
  0x33   : > { %s2689_s11 = scalar_lea.hbm %s3342_s0, %s3318_s14  ;;  %s2215_s15 = scalar_lea.hbm %s3342_s0, 4096 }
  0x34   : > { %s2210_s20 = scalar_lea.hbm %s2689_s11, 1024  ;;  %p2216_p5 = scmp.lt.u32.totalorder %s2689_s11, %s3342_s0 }
  0x35   : > { %p2211_p4 = scmp.ne.s32.totalorder %s2689_s11, %s2210_s20  ;;  %p2217_p10 = scmp.lt.u32.totalorder %s2215_s15, %s2210_s20 }
  0x36   : > { %p2219_p13 = scmp.lt.u32.totalorder %s2210_s20, %s2689_s11 }
  0x37   : > { %p2213_p8 = pnand %p2212_p6, %p2211_p4  ;;  %p2218_p11 = por %p2217_p10, %p2216_p5 }
  0x39   : > { %p2214_p9 = pneg %p2213_p8  ;;  %p2220_p0 = por %p2219_p13, %p2218_p11 }
  0x3b   : > { %p2221_p1 = pnand %p2220_p0, %p2214_p9 }
  0x3d   : > { %2224 = shalt.err (!%p2221_p1)
}
  0x3e   : > { %s2225_s9 = scalar_lea.vmem %s2699_s10, 1024  ;;  %s2518_s24 = smov [#allocation2]  }
  0x3f   : > { %p2226_p4 = scmp.ne.s32.totalorder %s2699_s10, %s2225_s9  ;;  %s2230_s4 = sshll.u32 %s2518_s24, 4  ;;  %s2231_s4 = int_to_ptr.vmem [resolvable:$false] %s2230_s4 }
  0x40   : > { %s2232_s17 = scalar_lea.vmem %s2231_s4, 2048  ;;  %p2233_p12 = scmp.lt.s32.totalorder %s2699_s10, %s2231_s4 }
  0x41   : > { %p2228_p8 = pnand %p2226_p4, %p2212_p6  ;;  %p2234_p5 = scmp.lt.s32.totalorder %s2232_s17, %s2225_s9 }
  0x43   : > { %p2229_p2 = pneg %p2228_p8  ;;  %p2235_p10 = por %p2234_p5, %p2233_p12 }
  0x45   : > { %p2236_p11 = pnand %p2235_p10, %p2229_p2 }
  0x47   : > { %2239 = shalt.err (!%p2236_p11)
}
  0x48   : > { %s2519_s14 = smov 128   ;;  %s2520_s20 = smov 8  }
  0x49   : > { %s3344_s9 = scalar_lea.sflag [#allocation3], %s2676_s18  ;;  %p1675_p12 = scmp.ge.s32.totalorder %s2516_s7, 1 }
  0x4a   : > { %2091 = dma.hbm_to_vmem [thread:$0]  (!%p2695_p3), %s2689_s11, 1024, %s2699_s10, %s3344_s9, %s2519_s14, %s2519_s14, %s2520_s20  }
  0x4b   : > { %p296_p2 = scmp.lt.s32.totalorder %s2516_s7, 5  ;;  %s3346_s24 = sshll.u32 %s2630_s13, 10 }
  0x4c   : > { %s3347_s1 = sld [smem:[#allocation29_spill]]  ;;  %s3348_s26 = sshll.u32 %s2676_s18, 6 }
  0x4d   : > { %p2734_p9 = pnand %p1675_p12, %p296_p2  ;;  %s279_s12 = scalar_lea.vmem [#allocation5], %s3348_s26 }
  0x4e   : > { %s288_s23 = sshll.u32 %s279_s12, 4  ;;  %s276_s10 = scalar_lea.sflag [#allocation6], %s2676_s18  ;;  %s2747_s23 = int_to_ptr.vmem [resolvable:$true] %s288_s23 }
  0x52   : > { %s2743_s0 = scalar_lea.hbm %s3347_s1, %s3346_s24  ;;  %s2245_s24 = scalar_lea.hbm %s3347_s1, 4096 }
  0x53   : > { %s2240_s11 = scalar_lea.hbm %s2743_s0, 1024  ;;  %p2246_p4 = scmp.lt.u32.totalorder %s2743_s0, %s3347_s1 }
  0x54   : > { %p2241_p13 = scmp.ne.s32.totalorder %s2743_s0, %s2240_s11  ;;  %p2247_p8 = scmp.lt.u32.totalorder %s2245_s24, %s2240_s11 }
  0x55   : > { %p2249_p10 = scmp.lt.u32.totalorder %s2240_s11, %s2743_s0 }
  0x56   : > { %p2243_p0 = pnand %p2241_p13, %p2212_p6  ;;  %p2248_p5 = por %p2247_p8, %p2246_p4 }
  0x58   : > { %p2244_p1 = pneg %p2243_p0  ;;  %p2250_p11 = por %p2249_p10, %p2248_p5 }
  0x5a   : > { %p2251_p12 = pnand %p2250_p11, %p2244_p1 }
  0x5c   : > { %2254 = shalt.err (!%p2251_p12)
}
  0x5d   : > { %s2255_s26 = scalar_lea.vmem %s2747_s23, 1024  ;;  %s2521_s12 = smov [#allocation5]  }
  0x5e   : > { %p2256_p2 = scmp.ne.s32.totalorder %s2747_s23, %s2255_s26  ;;  %s2260_s13 = sshll.u32 %s2521_s12, 4  ;;  %s2261_s13 = int_to_ptr.vmem [resolvable:$false] %s2260_s13 }
  0x5f   : > { %s2262_s9 = scalar_lea.vmem %s2261_s13, 2048  ;;  %p2263_p7 = scmp.lt.s32.totalorder %s2747_s23, %s2261_s13 }
  0x60   : > { %p2258_p13 = pnand %p2256_p2, %p2212_p6  ;;  %p2264_p4 = scmp.lt.s32.totalorder %s2262_s9, %s2255_s26 }
  0x62   : > { %p2259_p0 = pneg %p2258_p13  ;;  %p2265_p8 = por %p2264_p4, %p2263_p7 }
  0x64   : > { %p2266_p5 = pnand %p2265_p8, %p2259_p0 }
  0x66   : > { %2269 = shalt.err (!%p2266_p5)
}
  0x67   : > { %2094 = dma.hbm_to_vmem [thread:$0]  (!%p2695_p3), %s2743_s0, 1024, %s2747_s23, %s276_s10, %s2519_s14, %s2519_s14, %s2520_s20  }
  0x68   : > { %300 = sbr.rel (%p2734_p9) target bundleno = 665 (0x299), region = 28  ;;  %s302_s11 = sand.u32 (!%p2734_p9), 1, %s2492_s25  }
  0x69   : > { %s1676_s24 = sshll.u32 (!%p2734_p9), %s302_s11, 6  ;;  %s303_s4 = scalar_lea.sflag (!%p2734_p9), [#allocation3], %s302_s11 }
  0x6a   : > { %s2781_s17 = scalar_lea.vmem (!%p2734_p9), [#allocation2], %s1676_s24  ;;  %p3349_p7 = scmp.ne.s32.totalorder (!%p2734_p9), %s3336_s16, 0 }
  0x6f   : > { %2455 = dma.done.wait (%p3349_p7), %s303_s4, 1024  }
  0x70   : > { %2457 = vsyncadd (%p3349_p7), %s303_s4, 4294966272  ;;  %s312_s30 = scalar_lea.sflag [#allocation6], %s302_s11  ;;  %s2787_s18 = scalar_lea.vmem [#allocation5], %s1676_s24 }
  0x71   : > { %2459 = dma.done.wait (%p3349_p7), %s312_s30, 1024  }
  0x72   : > { %2461 = vsyncadd (%p3349_p7), %s312_s30, 4294966272  ;;  %s2794_s0 = sand.u32 1, %s2480_s22   ;;  %p1683_p3 = scmp.ne.s32.totalorder %s2500_s27, 0 }
  0x73   : > { %s1678_s23 = sshll.u32 %s2794_s0, 7  ;;  %s1681_s14 = sshll.u32 %s2794_s0, 3  ;;  %v2522_v0 = vmov (!%p1683_p3), 0.0  }
  0x74   : > { %s2798_s20 = scalar_lea.vmem [#allocation7], %s1678_s23  ;;  %s2800_s15 = scalar_lea.vmem [#allocation8], %s1678_s23 }
  0x75   : > { %s2802_s10 = scalar_lea.vmem [#allocation10], %s1678_s23  ;;  %s2804_s26 = scalar_lea.vmem [#allocation11], %s1681_s14  ;;  %379 = vst [vmem:[%s2798_s20] sm:$0xff] (!%p1683_p3), %v2522_v0  ;;  %380 = vst [vmem:[%s2798_s20 + $0x8] sm:$0xff] (!%p1683_p3), %v2522_v0 }
  0x76   : > { %s2806_s12 = scalar_lea.vmem [#allocation13], %s1681_s14  ;;  %378 = sbr.rel (%p1683_p3) target bundleno = 142 (0x8e), region = 40  ;;  %381 = vst [vmem:[%s2798_s20 + $0x10] sm:$0xff] (!%p1683_p3), %v2522_v0  ;;  %382 = vst [vmem:[%s2798_s20 + $0x18] sm:$0xff] (!%p1683_p3), %v2522_v0 }
  0x77   : > { %383 = vst [vmem:[%s2798_s20 + $0x20] sm:$0xff] (!%p1683_p3), %v2522_v0  ;;  %384 = vst [vmem:[%s2798_s20 + $0x28] sm:$0xff] (!%p1683_p3), %v2522_v0 }
  0x78   : > { %385 = vst [vmem:[%s2798_s20 + $0x30] sm:$0xff] (!%p1683_p3), %v2522_v0  ;;  %386 = vst [vmem:[%s2798_s20 + $0x38] sm:$0xff] (!%p1683_p3), %v2522_v0 }
  0x79   : > { %387 = vst [vmem:[%s2798_s20 + $0x40] sm:$0xff] (!%p1683_p3), %v2522_v0  ;;  %388 = vst [vmem:[%s2798_s20 + $0x48] sm:$0xff] (!%p1683_p3), %v2522_v0 }
  0x7a   : > { %389 = vst [vmem:[%s2798_s20 + $0x50] sm:$0xff] (!%p1683_p3), %v2522_v0  ;;  %390 = vst [vmem:[%s2798_s20 + $0x58] sm:$0xff] (!%p1683_p3), %v2522_v0 }
  0x7b   : > { %391 = vst [vmem:[%s2798_s20 + $0x60] sm:$0xff] (!%p1683_p3), %v2522_v0  ;;  %392 = vst [vmem:[%s2798_s20 + $0x68] sm:$0xff] (!%p1683_p3), %v2522_v0 }
  0x7c   : > { %393 = vst [vmem:[%s2798_s20 + $0x70] sm:$0xff] (!%p1683_p3), %v2522_v0  ;;  %394 = vst [vmem:[%s2798_s20 + $0x78] sm:$0xff] (!%p1683_p3), %v2522_v0 }
  0x7d   : > { %395 = vst [vmem:[%s2800_s15] sm:$0xff] %v2522_v0  ;;  %396 = vst [vmem:[%s2800_s15 + $0x8] sm:$0xff] %v2522_v0 }
  0x7e   : > { %397 = vst [vmem:[%s2800_s15 + $0x10] sm:$0xff] %v2522_v0  ;;  %398 = vst [vmem:[%s2800_s15 + $0x18] sm:$0xff] %v2522_v0 }
  0x7f   : > { %399 = vst [vmem:[%s2800_s15 + $0x20] sm:$0xff] %v2522_v0  ;;  %400 = vst [vmem:[%s2800_s15 + $0x28] sm:$0xff] %v2522_v0 }
  0x80   : > { %401 = vst [vmem:[%s2800_s15 + $0x30] sm:$0xff] %v2522_v0  ;;  %402 = vst [vmem:[%s2800_s15 + $0x38] sm:$0xff] %v2522_v0 }
  0x81   : > { %403 = vst [vmem:[%s2800_s15 + $0x40] sm:$0xff] %v2522_v0  ;;  %404 = vst [vmem:[%s2800_s15 + $0x48] sm:$0xff] %v2522_v0 }
  0x82   : > { %405 = vst [vmem:[%s2800_s15 + $0x50] sm:$0xff] %v2522_v0  ;;  %406 = vst [vmem:[%s2800_s15 + $0x58] sm:$0xff] %v2522_v0 }
  0x83   : > { %407 = vst [vmem:[%s2800_s15 + $0x60] sm:$0xff] %v2522_v0  ;;  %408 = vst [vmem:[%s2800_s15 + $0x68] sm:$0xff] %v2522_v0 }
  0x84   : > { %409 = vst [vmem:[%s2800_s15 + $0x70] sm:$0xff] %v2522_v0  ;;  %410 = vst [vmem:[%s2800_s15 + $0x78] sm:$0xff] %v2522_v0 }
  0x85   : > { %411 = vst [vmem:[%s2802_s10] sm:$0xff] %v2522_v0  ;;  %412 = vst [vmem:[%s2802_s10 + $0x8] sm:$0xff] %v2522_v0 }
  0x86   : > { %413 = vst [vmem:[%s2802_s10 + $0x10] sm:$0xff] %v2522_v0  ;;  %414 = vst [vmem:[%s2802_s10 + $0x18] sm:$0xff] %v2522_v0 }
  0x87   : > { %415 = vst [vmem:[%s2802_s10 + $0x20] sm:$0xff] %v2522_v0  ;;  %416 = vst [vmem:[%s2802_s10 + $0x28] sm:$0xff] %v2522_v0 }
  0x88   : > { %417 = vst [vmem:[%s2802_s10 + $0x30] sm:$0xff] %v2522_v0  ;;  %418 = vst [vmem:[%s2802_s10 + $0x38] sm:$0xff] %v2522_v0 }
  0x89   : > { %419 = vst [vmem:[%s2802_s10 + $0x40] sm:$0xff] %v2522_v0  ;;  %420 = vst [vmem:[%s2802_s10 + $0x48] sm:$0xff] %v2522_v0 }
  0x8a   : > { %421 = vst [vmem:[%s2802_s10 + $0x50] sm:$0xff] %v2522_v0  ;;  %422 = vst [vmem:[%s2802_s10 + $0x58] sm:$0xff] %v2522_v0 }
  0x8b   : > { %423 = vst [vmem:[%s2802_s10 + $0x60] sm:$0xff] %v2522_v0  ;;  %424 = vst [vmem:[%s2802_s10 + $0x68] sm:$0xff] %v2522_v0 }
  0x8c   : > { %425 = vst [vmem:[%s2802_s10 + $0x70] sm:$0xff] %v2522_v0  ;;  %426 = vst [vmem:[%s2802_s10 + $0x78] sm:$0xff] %v2522_v0 }
  0x8d   : > { %427 = vst [vmem:[%s2804_s26] sm:$0xff] %v2522_v0  ;;  %428 = vst [vmem:[%s2806_s12] sm:$0xff] %v2522_v0 }
  0x8e PF: > { %v429_v1 = vld [vmem:[%s2781_s17] sm:$0xff]  ;;  %v430_v2 = vld [vmem:[%s2781_s17 + $0x8] sm:$0xff]  ;;  %v431_v4 = vld [vmem:[%s2781_s17 + $0x10] sm:$0xff]  ;;  %v2523_v25 = vmov 0.0|0.0   ;;  %vm493_vm0 = vcmask 523264   ;;  %vm2524_vm1 = vmmov 0  }
  0x8f   : > { %461 = vxpose.xlu0.b32.start [1/8] (short) %v429_v1, 128  ;;  %v2861_v3 = vpack.c.bf16 %v430_v2, %v429_v1  ;;  %v432_v5 = vld [vmem:[%s2781_s17 + $0x18] sm:$0xff]  ;;  %v437_v7 = vld [vmem:[%s2787_s18] sm:$0xff]  ;;  %v438_v8 = vld [vmem:[%s2787_s18 + $0x8] sm:$0xff]  ;;  %v2525_v53 = vmov 0.0   ;;  %v2526_v54 = vmov 1.0   ;;  %s3040_s16 = sshll.u32 %s2504_s28, 11 }
  0x90   : > { %v2865_v6 = vpack.c.bf16 %v432_v5, %v431_v4  ;;  %928 = vxpose.xlu1.b32.start [1/8] (short) %v437_v7, 128  ;;  %v439_v9 = vld [vmem:[%s2787_s18 + $0x10] sm:$0xff]  ;;  %v440_v10 = vld [vmem:[%s2787_s18 + $0x18] sm:$0xff]  ;;  %v433_v11 = vld [vmem:[%s2781_s17 + $0x20] sm:$0xff]  ;;  %v2874_v13 = vpack.c.bf16 %v438_v8, %v437_v7  ;;  %s1384_s13 = sshll.u32 %s2800_s15, 4  ;;  %s3051_s24 = scalar_lea.hbm %s3308_s3, %s3040_s16  ;;  %s3053_s13 = int_to_ptr.vmem [resolvable:$true] %s1384_s13 }
  0x91   : > { %2003 = vmatprep.subr.bf16.mxu0 %v2861_v3  ;;  %v434_v12 = vld [vmem:[%s2781_s17 + $0x28] sm:$0xff]  ;;  %v2876_v14 = vpack.c.bf16 %v440_v10, %v439_v9  ;;  %v441_v16 = vld [vmem:[%s2787_s18 + $0x20] sm:$0xff]  ;;  %v435_v18 = vld [vmem:[%s2781_s17 + $0x30] sm:$0xff]  ;;  %s1368_s4 = sshll.u32 %s2798_s20, 4  ;;  %s1416_s30 = sshll.u32 %s2804_s26, 4  ;;  %s3069_s4 = int_to_ptr.vmem [resolvable:$true] %s1368_s4  ;;  %s3083_s30 = int_to_ptr.vmem [resolvable:$true] %s1416_s30 }
  0x92   : > { %2005 = vmatpush3.bf16.msra.mxu0 %v2861_v3  ;;  %v2879_v15 = vpack.c.bf16 %v434_v12, %v433_v11  ;;  %2019 = vmatprep.subr.bf16.mxu1 %v2874_v13  ;;  %v442_v17 = vld [vmem:[%s2787_s18 + $0x28] sm:$0xff]  ;;  %v436_v19 = vld [vmem:[%s2781_s17 + $0x38] sm:$0xff]  ;;  %v443_v22 = vld [vmem:[%s2787_s18 + $0x30] sm:$0xff]  ;;  %s3323_s17 = sshll.u32 %s2504_s28, 7  ;;  %s3067_s14 = scalar_lea.hbm %s3307_s2, %s3040_s16 }
  0x93   : > { %462 = vxpose.xlu0.b32.cont [2/8] (short) %v430_v2, 128  ;;  %2007 = vmatprep.subr.bf16.mxu0 %v2865_v6  ;;  %v2888_v20 = vpack.c.bf16 %v442_v17, %v441_v16  ;;  %v2014_v21 = vpack.c.bf16 %v436_v19, %v435_v18  ;;  %v444_v23 = vld [vmem:[%s2787_s18 + $0x38] sm:$0xff]  ;;  %v446_v60 = vld [vmem:[%s2798_s20 + $0x8] sm:$0xff]  ;;  %v445_v62 = vld [vmem:[%s2798_s20] sm:$0xff]  ;;  %s3081_s27 = scalar_lea.hbm %s3310_s5, %s3323_s17  ;;  %s3350_s18 = sand.u32 1, %s2623_s8  }
  0x94   : > { %929 = vxpose.xlu1.b32.cont [2/8] (short) %v438_v8, 128  ;;  %2021 = vmatpush3.bf16.msra.mxu1 %v2874_v13  ;;  %v2896_v24 = vpack.c.bf16 %v444_v23, %v443_v22  ;;  %v720_v61 = vld [vmem:[%s2800_s15 + $0x8] sm:$0xff]  ;;  %v719_v63 = vld [vmem:[%s2800_s15] sm:$0xff]  ;;  %v448_v8 = vld [vmem:[%s2798_s20 + $0x18] sm:$0xff]  ;;  %p3351_p9 = scmp.ne.s32.totalorder %s3339_s29, 0  ;;  %s2527_s23 = smov [#allocation8]  }
  0x95   : > { %2023 = vmatprep.subr.bf16.mxu1 %v2876_v14  ;;  %s2274_s1 = sshll.u32 %s2527_s23, 4  ;;  %s2275_s1 = int_to_ptr.vmem [resolvable:$false] %s2274_s1 }
  0x96   : > { %2009 = vmatpush3.bf16.msra.mxu0 %v2865_v6  ;;  %s2276_s9 = scalar_lea.vmem %s2275_s1, 4096  ;;  %p2277_p11 = scmp.lt.s32.totalorder %s3053_s13, %s2275_s1 }
  0x97   : > { %463 = vxpose.xlu0.b32.cont [3/8] (short) %v431_v4, 128  ;;  %2011 = vmatprep.subr.bf16.mxu0 %v2879_v15 }
  0x98   : > { %930 = vxpose.xlu1.b32.cont [3/8] (short) %v439_v9, 128  ;;  %2025 = vmatpush3.bf16.msra.mxu1 %v2876_v14  ;;  %v722_v9 = vld [vmem:[%s2800_s15 + $0x18] sm:$0xff] }
  0x99   : > { %2027 = vmatprep.subr.bf16.mxu1 %v2888_v20 }
  0x9a   : > { %2013 = vmatpush3.bf16.msra.mxu0 %v2879_v15 }
  0x9b   : > { %464 = vxpose.xlu0.b32.cont [4/8] (short) %v432_v5, 128  ;;  %2015 = vmatprep.subr.bf16.mxu0 %v2014_v21 }
  0x9c   : > { %931 = vxpose.xlu1.b32.cont [4/8] (short) %v440_v10, 128  ;;  %2029 = vmatpush3.bf16.msra.mxu1 %v2888_v20  ;;  %v447_v10 = vld [vmem:[%s2798_s20 + $0x10] sm:$0xff] }
  0x9d   : > { %2031 = vmatprep.subr.bf16.mxu1 %v2896_v24 }
  0x9e   : > { %2017 = vmatpush3.bf16.msra.mxu0 %v2014_v21 }
  0x9f   : > { %465 = vxpose.xlu0.b32.cont [5/8] (short) %v433_v11, 128  ;;  %2035 = vmatprep.subr.bf16.mxu0 %v2874_v13  ;;  %v721_v11 = vld [vmem:[%s2800_s15 + $0x10] sm:$0xff] }
  0xa0   : > { %932 = vxpose.xlu1.b32.cont [5/8] (short) %v441_v16, 128  ;;  %2033 = vmatpush3.bf16.msra.mxu1 %v2896_v24 }
  0xa1   : > { %2050 = vmatprep.subr.bf16.mxu1 %v2523_v25 }
  0xa3   : > { %466 = vxpose.xlu0.b32.cont [6/8] (short) %v434_v12, 128 }
  0xa4   : > { %933 = vxpose.xlu1.b32.cont [6/8] (short) %v442_v17, 128 }
  0xa7   : > { %467 = vxpose.xlu0.b32.cont [7/8] (short) %v435_v18, 128 }
  0xa8   : > { %934 = vxpose.xlu1.b32.cont [7/8] (short) %v443_v22, 128  ;;  %v449_v22 = vld [vmem:[%s2798_s20 + $0x20] sm:$0xff] }
  0xab   : > { %468 = vxpose.xlu0.b32.end [8/8] (short) %v436_v19, 128 }
  0xac   : > { %935 = vxpose.xlu1.b32.end [8/8] (short) %v444_v23, 128  ;;  %v723_v23 = vld [vmem:[%s2800_s15 + $0x20] sm:$0xff] }
 0x10f   : > { %v477_v26 = vpop.trf.xlu0 }
 0x110   : > { %1860 = vmatprep.mubr.msk.f32.mxu0 %vm493_vm0, %v477_v26  ;;  %1900 = vmatprep.mubr.msk.f32.mxu1 %vm493_vm0, %v477_v26  ;;  %v2907_v27 = vpop.trf.xlu1 }
 0x113   : > { %v478_v28 = vpop.trf.xlu0 }
 0x114   : > { %1861 = vmatmul.mubr.msk.f32.vlgmr.msra.gmra.mrb[0].mxu0 %vm493_vm0, %v478_v28  ;;  %1901 = vmatmul.mubr.msk.f32.vlgmr.msra.gmra.mrb[0].mxu1 %vm493_vm0, %v478_v28  ;;  %v2912_v29 = vpop.trf.xlu1 }
 0x115   : > { %2037 = vmatpush3.bf16.msra.mxu0 %v2874_v13  ;;  %2052 = vmatpush3.bf16.msra.mxu1 %v2861_v3 }
 0x116   : > { %2039 = vmatprep.subr.bf16.mxu0 %v2876_v14  ;;  %2053 = vmatprep.subr.bf16.mxu1 %v2523_v25 }
 0x117   : > { %v479_v30 = vpop.trf.xlu0 }
 0x118   : > { %1863 = vmatprep.mubr.msk.f32.mxu0 %vm493_vm0, %v479_v30  ;;  %1903 = vmatprep.mubr.msk.f32.mxu1 %vm493_vm0, %v479_v30  ;;  %v946_v32 = vpop.trf.xlu1 }
 0x119   : > { %2041 = vmatpush3.bf16.msra.mxu0 %v2876_v14  ;;  %2055 = vmatpush3.bf16.msra.mxu1 %v2865_v6 }
 0x11a   : > { %2043 = vmatprep.subr.bf16.mxu0 %v2888_v20  ;;  %2056 = vmatprep.subr.bf16.mxu1 %v2523_v25 }
 0x11b   : > { %v480_v31 = vpop.trf.xlu0 }
 0x11c   : > { %1864 = vmatmul.mubr.msk.f32.gmra.mrb[2].mxu0 %vm493_vm0, %v480_v31  ;;  %1904 = vmatmul.mubr.msk.f32.gmra.mrb[2].mxu1 %vm493_vm0, %v480_v31  ;;  %v947_v34 = vpop.trf.xlu1 }
 0x11d   : > { %2045 = vmatpush3.bf16.msra.mxu0 %v2888_v20  ;;  %2058 = vmatpush3.bf16.msra.mxu1 %v2879_v15 }
 0x11e   : > { %2047 = vmatprep.subr.bf16.mxu0 %v2896_v24  ;;  %2059 = vmatprep.subr.bf16.mxu1 %v2523_v25 }
 0x11f   : > { %v481_v33 = vpop.trf.xlu0 }
 0x120   : > { %1866 = vmatprep.mubr.msk.f32.mxu0 %vm493_vm0, %v481_v33  ;;  %1906 = vmatprep.mubr.msk.f32.mxu1 %vm493_vm0, %v481_v33  ;;  %v948_v37 = vpop.trf.xlu1  ;;  %v726_v33 = vld [vmem:[%s2800_s15 + $0x38] sm:$0xff] }
 0x121   : > { %2049 = vmatpush3.bf16.msra.mxu0 %v2896_v24  ;;  %2061 = vmatpush3.bf16.msra.mxu1 %v2014_v21  ;;  %v724_v21 = vld [vmem:[%s2800_s15 + $0x28] sm:$0xff] }
 0x122   : > { %2062 = vmatprep.subr.bf16.mxu1 %v2523_v25 }
 0x123   : > { %v482_v35 = vpop.trf.xlu0 }
 0x124   : > { %1867 = vmatmul.mubr.msk.f32.gmra.mrb[4].mxu0 %vm493_vm0, %v482_v35  ;;  %1907 = vmatmul.mubr.msk.f32.gmra.mrb[4].mxu1 %vm493_vm0, %v482_v35  ;;  %v949_v39 = vpop.trf.xlu1  ;;  %v725_v35 = vld [vmem:[%s2800_s15 + $0x30] sm:$0xff] }
 0x127   : > { %v483_v36 = vpop.trf.xlu0 }
 0x128   : > { %1869 = vmatprep.mubr.msk.f32.mxu0 %vm493_vm0, %v483_v36  ;;  %1909 = vmatprep.mubr.msk.f32.mxu1 %vm493_vm0, %v483_v36  ;;  %v950_v42 = vpop.trf.xlu1 }
 0x12b   : > { %v484_v38 = vpop.trf.xlu0 }
 0x12c   : > { %1870 = vmatmul.mubr.msk.f32.gmra.mrb[6].mxu0 %vm493_vm0, %v484_v38  ;;  %1910 = vmatmul.mubr.msk.f32.gmra.mrb[6].mxu1 %vm493_vm0, %v484_v38  ;;  %v951_v44 = vpop.trf.xlu1 }
 0x12f   : > { %v485_v40 = vpop.trf.xlu0 }
 0x130   : > { %1872 = vmatprep.mubr.msk.f32.mxu0 %vm493_vm0, %v485_v40  ;;  %1912 = vmatprep.mubr.msk.f32.mxu1 %vm493_vm0, %v485_v40  ;;  %v952_v47 = vpop.trf.xlu1 }
 0x133   : > { %v486_v41 = vpop.trf.xlu0 }
 0x134   : > { %1873 = vmatmul.mubr.msk.f32.gmra.mrb[8].mxu0 %vm493_vm0, %v486_v41  ;;  %1913 = vmatmul.mubr.msk.f32.gmra.mrb[8].mxu1 %vm493_vm0, %v486_v41  ;;  %v953_v49 = vpop.trf.xlu1 }
 0x137   : > { %v487_v43 = vpop.trf.xlu0 }
 0x138   : > { %1875 = vmatprep.mubr.msk.f32.mxu0 %vm493_vm0, %v487_v43  ;;  %1915 = vmatprep.mubr.msk.f32.mxu1 %vm493_vm0, %v487_v43  ;;  %v954_v52 = vpop.trf.xlu1 }
 0x13b   : > { %v488_v45 = vpop.trf.xlu0 }
 0x13c   : > { %1876 = vmatmul.mubr.msk.f32.gmra.mrb[10].mxu0 %vm493_vm0, %v488_v45  ;;  %1916 = vmatmul.mubr.msk.f32.gmra.mrb[10].mxu1 %vm493_vm0, %v488_v45  ;;  %v955_v55 = vpop.trf.xlu1  ;;  %v728_v45 = vld [vmem:[%s2800_s15 + $0x48] sm:$0xff] }
 0x13f   : > { %v489_v46 = vpop.trf.xlu0 }
 0x140   : > { %1878 = vmatprep.mubr.msk.f32.mxu0 %vm493_vm0, %v489_v46  ;;  %1918 = vmatprep.mubr.msk.f32.mxu1 %vm493_vm0, %v489_v46  ;;  %v956_v56 = vpop.trf.xlu1  ;;  %v453_v46 = vld [vmem:[%s2798_s20 + $0x40] sm:$0xff] }
 0x143   : > { %v490_v48 = vpop.trf.xlu0 }
 0x144   : > { %1879 = vmatmul.mubr.msk.f32.gmra.mrb[12].mxu0 %vm493_vm0, %v490_v48  ;;  %1919 = vmatmul.mubr.msk.f32.gmra.mrb[12].mxu1 %vm493_vm0, %v490_v48  ;;  %v957_v57 = vpop.trf.xlu1 }
 0x147   : > { %v491_v50 = vpop.trf.xlu0 }
 0x148   : > { %1881 = vmatprep.mubr.msk.f32.mxu0 %vm493_vm0, %v491_v50  ;;  %1921 = vmatprep.mubr.msk.f32.mxu1 %vm493_vm0, %v491_v50  ;;  %v958_v58 = vpop.trf.xlu1 }
 0x14b   : > { %v492_v51 = vpop.trf.xlu0 }
 0x14c   : > { %1882 = vmatmul.mubr.msk.f32.gmra.mrb[14].mxu0 %vm493_vm0, %v492_v51  ;;  %1922 = vmatmul.mubr.msk.f32.gmra.mrb[14].mxu1 %vm493_vm0, %v492_v51  ;;  %v959_v59 = vpop.trf.xlu1 }
 0x14d   : > { %1940 = vmatprep.mubr.msk.f32.mxu0 %vm493_vm0, %v2907_v27  ;;  %1980 = vmatprep.mubr.msk.f32.mxu1 %vm2524_vm1, %v2525_v53 }
 0x150   : > { %1941 = vmatmul.mubr.msk.f32.vlgmr.msra.gmra.mrb[16].mxu0 %vm493_vm0, %v2912_v29  ;;  %1981 = vmatmul.mubr.msk.f32.vlgmr.msra.gmra.mrb[16].mxu1 %vm493_vm0, %v2526_v54 }
 0x151   : > { %1943 = vmatprep.mubr.msk.f32.mxu0 %vm493_vm0, %v946_v32  ;;  %2064 = vmatpush3.bf16.msra.mxu1 %v2874_v13  ;;  %v452_v32 = vld [vmem:[%s2798_s20 + $0x38] sm:$0xff] }
 0x152   : > { %2065 = vmatprep.subr.bf16.mxu1 %v2523_v25  ;;  %1999 = vmatprep.mubr.msk.f32.mxu1 %vm2524_vm1, %v2525_v53 }
 0x154   : > { %1944 = vmatmul.mubr.msk.f32.gmra.mrb[18].mxu0 %vm493_vm0, %v947_v34  ;;  %v451_v34 = vld [vmem:[%s2798_s20 + $0x30] sm:$0xff] }
 0x155   : > { %1946 = vmatprep.mubr.msk.f32.mxu0 %vm493_vm0, %v948_v37  ;;  %2067 = vmatpush3.bf16.msra.mxu1 %v2876_v14 }
 0x156   : > { %2068 = vmatprep.subr.bf16.mxu1 %v2523_v25 }
 0x158   : > { %1947 = vmatmul.mubr.msk.f32.gmra.mrb[20].mxu0 %vm493_vm0, %v949_v39 }
 0x159   : > { %1949 = vmatprep.mubr.msk.f32.mxu0 %vm493_vm0, %v950_v42  ;;  %2070 = vmatpush3.bf16.msra.mxu1 %v2888_v20  ;;  %v450_v20 = vld [vmem:[%s2798_s20 + $0x28] sm:$0xff] }
 0x15a   : > { %2071 = vmatprep.subr.bf16.mxu1 %v2523_v25 }
 0x15c   : > { %1950 = vmatmul.mubr.msk.f32.gmra.mrb[22].mxu0 %vm493_vm0, %v951_v44  ;;  %v454_v44 = vld [vmem:[%s2798_s20 + $0x48] sm:$0xff] }
 0x15d   : > { %1952 = vmatprep.mubr.msk.f32.mxu0 %vm493_vm0, %v952_v47  ;;  %2073 = vmatpush3.bf16.msra.mxu1 %v2896_v24  ;;  %v727_v47 = vld [vmem:[%s2800_s15 + $0x40] sm:$0xff] }
 0x160   : > { %1953 = vmatmul.mubr.msk.f32.gmra.mrb[24].mxu0 %vm493_vm0, %v953_v49  ;;  %2000 = vmatmul.mubr.msk.f32.vlgmr.msra.gmra.mrb[18].mxu1 %vm493_vm0, %v2526_v54 }
 0x161   : > { %1955 = vmatprep.mubr.msk.f32.mxu0 %vm493_vm0, %v954_v52 }
 0x164   : > { %1956 = vmatmul.mubr.msk.f32.gmra.mrb[26].mxu0 %vm493_vm0, %v955_v55 }
 0x165   : > { %1958 = vmatprep.mubr.msk.f32.mxu0 %vm493_vm0, %v956_v56  ;;  %v456_v56 = vld [vmem:[%s2798_s20 + $0x58] sm:$0xff] }
 0x168   : > { %1959 = vmatmul.mubr.msk.f32.gmra.mrb[28].mxu0 %vm493_vm0, %v957_v57  ;;  %v730_v57 = vld [vmem:[%s2800_s15 + $0x58] sm:$0xff] }
 0x169   : > { %1961 = vmatprep.mubr.msk.f32.mxu0 %vm493_vm0, %v958_v58  ;;  %v455_v58 = vld [vmem:[%s2798_s20 + $0x50] sm:$0xff] }
 0x16c   : > { %1962 = vmatmul.mubr.msk.f32.gmra.mrb[30].mxu0 %vm493_vm0, %v959_v59  ;;  %v729_v59 = vld [vmem:[%s2800_s15 + $0x50] sm:$0xff] }
 0x1e7   : > { %v1862_v0 = vpop.f32.mrb[0].mxu0  ;;  %v1902_v1 = vpop.f32.mrb[0].mxu1 }
 0x1e8   : > { %v688_v2 = vadd.f32 %v1862_v0, %v446_v60  ;;  %v881_v3 = vadd.f32 %v1902_v1, %v720_v61  ;;  %v608_v4 = vpop.f32.mrb[1].mxu0  ;;  %v801_v5 = vpop.f32.mrb[1].mxu1 }
 0x1e9   : > { %v687_v6 = vadd.f32 %v608_v4, %v445_v62  ;;  %v880_v7 = vadd.f32 %v801_v5, %v719_v63  ;;  %v458_v4 = vld [vmem:[%s2798_s20 + $0x68] sm:$0xff] }
 0x1ea   : > { %704 = vst [vmem:[%s2798_s20 + $0x8] sm:$0xff] %v688_v2  ;;  %897 = vst [vmem:[%s2800_s15 + $0x8] sm:$0xff] %v881_v3  ;;  %v732_v5 = vld [vmem:[%s2800_s15 + $0x68] sm:$0xff] }
 0x1eb   : > { %703 = vst [vmem:[%s2798_s20] sm:$0xff] %v687_v6  ;;  %896 = vst [vmem:[%s2800_s15] sm:$0xff] %v880_v7  ;;  %v457_v6 = vld [vmem:[%s2798_s20 + $0x60] sm:$0xff] }
 0x1ec   : > { %v731_v7 = vld [vmem:[%s2800_s15 + $0x60] sm:$0xff] }
 0x1ef   : > { %v1865_v12 = vpop.f32.mrb[2].mxu0  ;;  %v1905_v13 = vpop.f32.mrb[2].mxu1 }
 0x1f0   : > { %v690_v14 = vadd.f32 %v1865_v12, %v448_v8  ;;  %v883_v15 = vadd.f32 %v1905_v13, %v722_v9  ;;  %v618_v16 = vpop.f32.mrb[3].mxu0  ;;  %v811_v17 = vpop.f32.mrb[3].mxu1 }
 0x1f1   : > { %v689_v18 = vadd.f32 %v618_v16, %v447_v10  ;;  %v882_v19 = vadd.f32 %v811_v17, %v721_v11  ;;  %v460_v16 = vld [vmem:[%s2798_s20 + $0x78] sm:$0xff] }
 0x1f2   : > { %706 = vst [vmem:[%s2798_s20 + $0x18] sm:$0xff] %v690_v14  ;;  %899 = vst [vmem:[%s2800_s15 + $0x18] sm:$0xff] %v883_v15  ;;  %v734_v17 = vld [vmem:[%s2800_s15 + $0x78] sm:$0xff] }
 0x1f3   : > { %705 = vst [vmem:[%s2798_s20 + $0x10] sm:$0xff] %v689_v18  ;;  %898 = vst [vmem:[%s2800_s15 + $0x10] sm:$0xff] %v882_v19  ;;  %v459_v18 = vld [vmem:[%s2798_s20 + $0x70] sm:$0xff] }
 0x1f4   : > { %v733_v19 = vld [vmem:[%s2800_s15 + $0x70] sm:$0xff] }
 0x1f7   : > { %v1868_v24 = vpop.f32.mrb[4].mxu0  ;;  %v1908_v25 = vpop.f32.mrb[4].mxu1 }
 0x1f8   : > { %v692_v26 = vadd.f32 %v1868_v24, %v450_v20  ;;  %v885_v27 = vadd.f32 %v1908_v25, %v724_v21  ;;  %v628_v28 = vpop.f32.mrb[5].mxu0  ;;  %v821_v29 = vpop.f32.mrb[5].mxu1 }
 0x1f9   : > { %v691_v30 = vadd.f32 %v628_v28, %v449_v22  ;;  %v884_v31 = vadd.f32 %v821_v29, %v723_v23  ;;  %v913_v28 = vld [vmem:[%s2802_s10 + $0x8] sm:$0xff] }
 0x1fa   : > { %708 = vst [vmem:[%s2798_s20 + $0x28] sm:$0xff] %v692_v26  ;;  %901 = vst [vmem:[%s2800_s15 + $0x28] sm:$0xff] %v885_v27  ;;  %v1185_v29 = vld [vmem:[%s2804_s26] sm:$0xff] }
 0x1fb   : > { %707 = vst [vmem:[%s2798_s20 + $0x20] sm:$0xff] %v691_v30  ;;  %900 = vst [vmem:[%s2800_s15 + $0x20] sm:$0xff] %v884_v31  ;;  %v912_v30 = vld [vmem:[%s2802_s10] sm:$0xff] }
 0x1ff   : > { %v1871_v36 = vpop.f32.mrb[6].mxu0  ;;  %v1911_v37 = vpop.f32.mrb[6].mxu1 }
 0x200   : > { %v694_v38 = vadd.f32 %v1871_v36, %v452_v32  ;;  %v887_v39 = vadd.f32 %v1911_v37, %v726_v33  ;;  %v638_v40 = vpop.f32.mrb[7].mxu0  ;;  %v831_v41 = vpop.f32.mrb[7].mxu1  ;;  %v3074_v32 = vld [vmem:[%s2802_s10 + $0x18] sm:$0xff] }
 0x201   : > { %v693_v42 = vadd.f32 %v638_v40, %v451_v34  ;;  %v886_v43 = vadd.f32 %v831_v41, %v725_v35 }
 0x202   : > { %710 = vst [vmem:[%s2798_s20 + $0x38] sm:$0xff] %v694_v38  ;;  %903 = vst [vmem:[%s2800_s15 + $0x38] sm:$0xff] %v887_v39 }
 0x203   : > { %709 = vst [vmem:[%s2798_s20 + $0x30] sm:$0xff] %v693_v42  ;;  %902 = vst [vmem:[%s2800_s15 + $0x30] sm:$0xff] %v886_v43 }
 0x207   : > { %v1874_v48 = vpop.f32.mrb[8].mxu0  ;;  %v1914_v49 = vpop.f32.mrb[8].mxu1 }
 0x208   : > { %v696_v50 = vadd.f32 %v1874_v48, %v454_v44  ;;  %v889_v51 = vadd.f32 %v1914_v49, %v728_v45  ;;  %v648_v52 = vpop.f32.mrb[9].mxu0  ;;  %v841_v53 = vpop.f32.mrb[9].mxu1 }
 0x209   : > { %v695_v54 = vadd.f32 %v648_v52, %v453_v46  ;;  %v888_v55 = vadd.f32 %v841_v53, %v727_v47 }
 0x20a   : > { %712 = vst [vmem:[%s2798_s20 + $0x48] sm:$0xff] %v696_v50  ;;  %905 = vst [vmem:[%s2800_s15 + $0x48] sm:$0xff] %v889_v51 }
 0x20b   : > { %711 = vst [vmem:[%s2798_s20 + $0x40] sm:$0xff] %v695_v54  ;;  %904 = vst [vmem:[%s2800_s15 + $0x40] sm:$0xff] %v888_v55 }
 0x20f   : > { %v1877_v60 = vpop.f32.mrb[10].mxu0  ;;  %v1917_v61 = vpop.f32.mrb[10].mxu1 }
 0x210   : > { %v698_v62 = vadd.f32 %v1877_v60, %v456_v56  ;;  %v891_v63 = vadd.f32 %v1917_v61, %v730_v57  ;;  %v658_v0 = vpop.f32.mrb[11].mxu0  ;;  %v851_v1 = vpop.f32.mrb[11].mxu1 }
 0x211   : > { %v697_v2 = vadd.f32 %v658_v0, %v455_v58  ;;  %v890_v3 = vadd.f32 %v851_v1, %v729_v59 }
 0x212   : > { %714 = vst [vmem:[%s2798_s20 + $0x58] sm:$0xff] %v698_v62  ;;  %907 = vst [vmem:[%s2800_s15 + $0x58] sm:$0xff] %v891_v63 }
 0x213   : > { %713 = vst [vmem:[%s2798_s20 + $0x50] sm:$0xff] %v697_v2  ;;  %906 = vst [vmem:[%s2800_s15 + $0x50] sm:$0xff] %v890_v3 }
 0x217   : > { %v1880_v8 = vpop.f32.mrb[12].mxu0  ;;  %v1920_v9 = vpop.f32.mrb[12].mxu1 }
 0x218   : > { %v700_v10 = vadd.f32 %v1880_v8, %v458_v4  ;;  %v893_v11 = vadd.f32 %v1920_v9, %v732_v5  ;;  %v668_v12 = vpop.f32.mrb[13].mxu0  ;;  %v861_v13 = vpop.f32.mrb[13].mxu1 }
 0x219   : > { %v699_v14 = vadd.f32 %v668_v12, %v457_v6  ;;  %v892_v15 = vadd.f32 %v861_v13, %v731_v7 }
 0x21a   : > { %716 = vst [vmem:[%s2798_s20 + $0x68] sm:$0xff] %v700_v10  ;;  %909 = vst [vmem:[%s2800_s15 + $0x68] sm:$0xff] %v893_v11 }
 0x21b   : > { %715 = vst [vmem:[%s2798_s20 + $0x60] sm:$0xff] %v699_v14  ;;  %908 = vst [vmem:[%s2800_s15 + $0x60] sm:$0xff] %v892_v15 }
 0x21f   : > { %v1883_v20 = vpop.f32.mrb[14].mxu0  ;;  %v1923_v21 = vpop.f32.mrb[14].mxu1 }
 0x220   : > { %v702_v22 = vadd.f32 %v1883_v20, %v460_v16  ;;  %v895_v23 = vadd.f32 %v1923_v21, %v734_v17  ;;  %v678_v24 = vpop.f32.mrb[15].mxu0  ;;  %v871_v25 = vpop.f32.mrb[15].mxu1 }
 0x221   : > { %v701_v26 = vadd.f32 %v678_v24, %v459_v18  ;;  %v894_v27 = vadd.f32 %v871_v25, %v733_v19 }
 0x222   : > { %718 = vst [vmem:[%s2798_s20 + $0x78] sm:$0xff] %v702_v22  ;;  %911 = vst [vmem:[%s2800_s15 + $0x78] sm:$0xff] %v895_v23 }
 0x223   : > { %717 = vst [vmem:[%s2798_s20 + $0x70] sm:$0xff] %v701_v26  ;;  %910 = vst [vmem:[%s2800_s15 + $0x70] sm:$0xff] %v894_v27  ;;  %v1942_v31 = vpop.f32.mrb[16].mxu0  ;;  %v1255_v33 = vpop.f32.mrb[16].mxu1  ;;  %s3087_s20 = scalar_lea.sflag [#allocation9], %s3350_s18  ;;  %s2270_s15 = scalar_lea.vmem %s3053_s13, 2048 }
 0x224   : > { %v1154_v34 = vadd.f32 %v1942_v31, %v913_v28  ;;  %v1074_v35 = vpop.f32.mrb[17].mxu0  ;;  %v1259_v36 = vadd.f32 %v1255_v33, %v1185_v29  ;;  %v1982_v37 = vpop.f32.mrb[17].mxu1  ;;  %p2271_p6 = scmp.ne.s32.totalorder %s3053_s13, %s2270_s15  ;;  %p2278_p12 = scmp.lt.s32.totalorder %s2276_s9, %s2270_s15 }
 0x226   : > { %p2272_p1 = pnand %p2271_p6, %p3351_p9  ;;  %p2279_p2 = por %p2278_p12, %p2277_p11 }
 0x228   : > { %p2273_p10 = pneg %p2272_p1 }
 0x22a   : > { %p2280_p13 = pnand %p2279_p2, %p2273_p10 }
 0x22c   : > { %2283 = shalt.err (!%p2280_p13)
}
 0x22d   : > { %s2284_s11 = scalar_lea.hbm %s3051_s24, 2048  ;;  %s2288_s23 = scalar_lea.hbm %s3308_s3, 4096 }
 0x22e   : > { %p2285_p0 = scmp.ne.s32.totalorder %s3051_s24, %s2284_s11  ;;  %p2289_p5 = scmp.lt.u32.totalorder %s3051_s24, %s3308_s3 }
 0x22f   : > { %p2290_p7 = scmp.lt.u32.totalorder %s2288_s23, %s2284_s11  ;;  %p2292_p6 = scmp.lt.u32.totalorder %s2284_s11, %s3051_s24 }
 0x230   : > { %p2286_p4 = pnand %p2285_p0, %p3351_p9 }
 0x231   : > { %p2291_p3 = por %p2290_p7, %p2289_p5 }
 0x232   : > { %p2287_p8 = pneg %p2286_p4 }
 0x233   : > { %p2293_p1 = por %p2292_p6, %p2291_p3 }
 0x235   : > { %p2294_p10 = pnand %p2293_p1, %p2287_p8 }
 0x237   : > { %2297 = shalt.err (!%p2294_p10)
}
 0x238   : > { %s2528_s15 = smov 128   ;;  %s2529_s17 = smov 8   ;;  %v1153_v38 = vadd.f32 %v1074_v35, %v912_v30 }
 0x239   : > { %2079 = dma.vmem_to_hbm [thread:$0]  (%p3351_p9), %s3053_s13, 2048, %s3051_s24, %s3087_s20, %s2528_s15, %s2528_s15, %s2529_s17  }
 0x23a   : > { %s2298_s9 = scalar_lea.vmem %s3069_s4, 2048  ;;  %s2530_s11 = smov [#allocation7]  }
 0x23b   : > { %p2299_p11 = scmp.ne.s32.totalorder %s3069_s4, %s2298_s9  ;;  %s2302_s18 = sshll.u32 %s2530_s11, 4  ;;  %s2303_s18 = int_to_ptr.vmem [resolvable:$false] %s2302_s18 }
 0x23c   : > { %s2304_s23 = scalar_lea.vmem %s2303_s18, 4096  ;;  %p2305_p13 = scmp.lt.s32.totalorder %s3069_s4, %s2303_s18 }
 0x23d   : > { %p2300_p12 = pnand %p2299_p11, %p3351_p9  ;;  %p2306_p0 = scmp.lt.s32.totalorder %s2304_s23, %s2298_s9 }
 0x23f   : > { %p2301_p2 = pneg %p2300_p12  ;;  %p2307_p4 = por %p2306_p0, %p2305_p13 }
 0x241   : > { %p2308_p8 = pnand %p2307_p4, %p2301_p2 }
 0x243   : > { %2311 = shalt.err (!%p2308_p8)
}
 0x244   : > { %s2312_s13 = scalar_lea.hbm %s3067_s14, 2048  ;;  %s2316_s11 = scalar_lea.hbm %s3307_s2, 4096 }
 0x245   : > { %p2313_p5 = scmp.ne.s32.totalorder %s3067_s14, %s2312_s13  ;;  %p2317_p6 = scmp.lt.u32.totalorder %s3067_s14, %s3307_s2 }
 0x246   : > { %p2318_p1 = scmp.lt.u32.totalorder %s2316_s11, %s2312_s13  ;;  %p2320_p11 = scmp.lt.u32.totalorder %s2312_s13, %s3067_s14 }
 0x247   : > { %p2314_p7 = pnand %p2313_p5, %p3351_p9 }
 0x248   : > { %p2319_p10 = por %p2318_p1, %p2317_p6 }
 0x249   : > { %p2315_p3 = pneg %p2314_p7 }
 0x24a   : > { %p2321_p12 = por %p2320_p11, %p2319_p10 }
 0x24c   : > { %p2322_p2 = pnand %p2321_p12, %p2315_p3 }
 0x24e   : > { %2325 = shalt.err (!%p2322_p2)
}
 0x24f   : > { %s3352_s9 = scalar_lea.sflag [#allocation4], %s2794_s0  ;;  %1170 = vst [vmem:[%s2802_s10 + $0x8] sm:$0xff] %v1154_v34  ;;  %v914_v39 = vld [vmem:[%s2802_s10 + $0x10] sm:$0xff]  ;;  %1260 = vst [vmem:[%s2804_s26] sm:$0xff] %v1259_v36  ;;  %v1945_v40 = vpop.f32.mrb[18].mxu0  ;;  %s3353_s25 = sand.u32 1, %s2623_s8  }
 0x250   : > { %2078 = dma.vmem_to_hbm [thread:$0]  (%p3351_p9), %s3069_s4, 2048, %s3067_s14, %s3352_s9, %s2528_s15, %s2528_s15, %s2529_s17  }
 0x251   : > { %1169 = vst [vmem:[%s2802_s10] sm:$0xff] %v1153_v38  ;;  %s3147_s23 = scalar_lea.sflag [#allocation12], %s3353_s25  ;;  %s2326_s0 = scalar_lea.vmem %s3083_s30, 128 }
 0x252   : > { %p2327_p13 = scmp.ne.s32.totalorder %s3083_s30, %s2326_s0  ;;  %s2531_s13 = smov [#allocation11]  }
 0x253   : > { %s2330_s24 = sshll.u32 %s2531_s13, 4  ;;  %s2331_s24 = int_to_ptr.vmem [resolvable:$false] %s2330_s24 }
 0x254   : > { %p2328_p0 = pnand %p2327_p13, %p3351_p9  ;;  %s2332_s1 = scalar_lea.vmem %s2331_s24, 256 }
 0x255   : > { %p2333_p8 = scmp.lt.s32.totalorder %s3083_s30, %s2331_s24  ;;  %p2334_p5 = scmp.lt.s32.totalorder %s2332_s1, %s2326_s0 }
 0x256   : > { %p2329_p4 = pneg %p2328_p0 }
 0x257   : > { %p2335_p7 = por %p2334_p5, %p2333_p8 }
 0x259   : > { %p2336_p3 = pnand %p2335_p7, %p2329_p4 }
 0x25b   : > { %2339 = shalt.err (!%p2336_p3)
}
 0x25c   : > { %s2340_s8 = scalar_lea.hbm %s3081_s27, 128  ;;  %s2344_s14 = scalar_lea.hbm %s3310_s5, 256 }
 0x25d   : > { %p2341_p6 = scmp.ne.s32.totalorder %s3081_s27, %s2340_s8  ;;  %p2345_p11 = scmp.lt.u32.totalorder %s3081_s27, %s3310_s5 }
 0x25e   : > { %p2346_p12 = scmp.lt.u32.totalorder %s2344_s14, %s2340_s8  ;;  %p2348_p13 = scmp.lt.u32.totalorder %s2340_s8, %s3081_s27 }
 0x25f   : > { %p2342_p1 = pnand %p2341_p6, %p3351_p9 }
 0x260   : > { %p2347_p2 = por %p2346_p12, %p2345_p11 }
 0x261   : > { %p2343_p10 = pneg %p2342_p1 }
 0x262   : > { %p2349_p0 = por %p2348_p13, %p2347_p2 }
 0x264   : > { %p2350_p4 = pnand %p2349_p0, %p2343_p10 }
 0x266   : > { %2353 = shalt.err (!%p2350_p4)
}
 0x267   : > { %2081 = dma.vmem_to_hbm [thread:$0]  (%p3351_p9), %s3083_s30, 128, %s3081_s27, %s3147_s23   ;;  %v1156_v41 = vadd.f32 %v1945_v40, %v3074_v32  ;;  %v1084_v42 = vpop.f32.mrb[19].mxu0  ;;  %v917_v44 = vld [vmem:[%s2802_s10 + $0x28] sm:$0xff]  ;;  %v916_v45 = vld [vmem:[%s2802_s10 + $0x20] sm:$0xff]  ;;  %v919_v50 = vld [vmem:[%s2802_s10 + $0x38] sm:$0xff]  ;;  %v1328_v60 = vpop.f32.mrb[18].mxu1 }
 0x268   : > { %v1155_v43 = vadd.f32 %v1084_v42, %v914_v39  ;;  %v1948_v46 = vpop.f32.mrb[20].mxu0  ;;  %v918_v51 = vld [vmem:[%s2802_s10 + $0x30] sm:$0xff]  ;;  %v921_v56 = vld [vmem:[%s2802_s10 + $0x48] sm:$0xff]  ;;  %s1429_s27 = sshll.u32 %s2806_s12, 4  ;;  %v920_v58 = vld [vmem:[%s2802_s10 + $0x40] sm:$0xff]  ;;  %v2001_v0 = vpop.f32.mrb[19].mxu1  ;;  %s3193_s27 = int_to_ptr.vmem [resolvable:$true] %s1429_s27 }
 0x269   : > { %1172 = vst [vmem:[%s2802_s10 + $0x18] sm:$0xff] %v1156_v41  ;;  %v1158_v47 = vadd.f32 %v1948_v46, %v917_v44  ;;  %v1094_v48 = vpop.f32.mrb[21].mxu0  ;;  %v1261_v57 = vld [vmem:[%s2806_s12] sm:$0xff]  ;;  %s3354_s30 = sshll.u32 %s2504_s28, 7  ;;  %s2354_s13 = scalar_lea.vmem %s3193_s27, 128 }
 0x26a   : > { %1171 = vst [vmem:[%s2802_s10 + $0x10] sm:$0xff] %v1155_v43  ;;  %v1157_v49 = vadd.f32 %v1094_v48, %v916_v45  ;;  %v1951_v52 = vpop.f32.mrb[22].mxu0  ;;  %v1332_v63 = vadd.f32 %v1328_v60, %v1261_v57  ;;  %s3191_s0 = scalar_lea.hbm %s3311_s6, %s3354_s30  ;;  %v923_v2 = vld [vmem:[%s2802_s10 + $0x58] sm:$0xff]  ;;  %v922_v3 = vld [vmem:[%s2802_s10 + $0x50] sm:$0xff]  ;;  %p2355_p8 = scmp.ne.s32.totalorder %s3193_s27, %s2354_s13 }
 0x26b   : > { %1174 = vst [vmem:[%s2802_s10 + $0x28] sm:$0xff] %v1158_v47  ;;  %v1160_v53 = vadd.f32 %v1951_v52, %v919_v50  ;;  %v1104_v54 = vpop.f32.mrb[23].mxu0  ;;  %s2532_s28 = smov [#allocation13]  }
 0x26c   : > { %1173 = vst [vmem:[%s2802_s10 + $0x20] sm:$0xff] %v1157_v49  ;;  %v1159_v55 = vadd.f32 %v1104_v54, %v918_v51  ;;  %v1954_v59 = vpop.f32.mrb[24].mxu0  ;;  %1333 = vst [vmem:[%s2806_s12] sm:$0xff] %v1332_v63  ;;  %p2356_p5 = pnand %p2355_p8, %p3351_p9  ;;  %s2358_s24 = sshll.u32 %s2532_s28, 4  ;;  %s2359_s24 = int_to_ptr.vmem [resolvable:$false] %s2358_s24 }
 0x26d   : > { %1176 = vst [vmem:[%s2802_s10 + $0x38] sm:$0xff] %v1160_v53  ;;  %v1162_v61 = vadd.f32 %v1954_v59, %v921_v56  ;;  %v1114_v62 = vpop.f32.mrb[25].mxu0  ;;  %s2360_s1 = scalar_lea.vmem %s2359_s24, 256  ;;  %p2361_p3 = scmp.lt.s32.totalorder %s3193_s27, %s2359_s24 }
 0x26e   : > { %1175 = vst [vmem:[%s2802_s10 + $0x30] sm:$0xff] %v1159_v55  ;;  %v1161_v1 = vadd.f32 %v1114_v62, %v920_v58  ;;  %v1957_v4 = vpop.f32.mrb[26].mxu0  ;;  %p2357_p7 = pneg %p2356_p5  ;;  %p2362_p6 = scmp.lt.s32.totalorder %s2360_s1, %s2354_s13 }
 0x26f   : > { %1178 = vst [vmem:[%s2802_s10 + $0x48] sm:$0xff] %v1162_v61 }
 0x270   : > { %1177 = vst [vmem:[%s2802_s10 + $0x40] sm:$0xff] %v1161_v1  ;;  %p2363_p1 = por %p2362_p6, %p2361_p3 }
 0x272   : > { %p2364_p10 = pnand %p2363_p1, %p2357_p7 }
 0x274   : > { %2367 = shalt.err (!%p2364_p10)
}
 0x275   : > { %s2368_s12 = scalar_lea.hbm %s3191_s0, 128  ;;  %s2372_s4 = scalar_lea.hbm %s3311_s6, 256 }
 0x276   : > { %p2369_p11 = scmp.ne.s32.totalorder %s3191_s0, %s2368_s12  ;;  %p2373_p13 = scmp.lt.u32.totalorder %s3191_s0, %s3311_s6 }
 0x277   : > { %p2374_p0 = scmp.lt.u32.totalorder %s2372_s4, %s2368_s12  ;;  %p2376_p8 = scmp.lt.u32.totalorder %s2368_s12, %s3191_s0 }
 0x278   : > { %p2370_p12 = pnand %p2369_p11, %p3351_p9 }
 0x279   : > { %p2375_p4 = por %p2374_p0, %p2373_p13 }
 0x27a   : > { %p2371_p2 = pneg %p2370_p12 }
 0x27b   : > { %p2377_p5 = por %p2376_p8, %p2375_p4 }
 0x27d   : > { %p2378_p7 = pnand %p2377_p5, %p2371_p2 }
 0x27f   : > { %2381 = shalt.err (!%p2378_p7)
}
 0x280   : > { %2082 = dma.vmem_to_hbm [thread:$0]  (%p3351_p9), %s3193_s27, 128, %s3191_s0, %s3147_s23   ;;  %v1164_v5 = vadd.f32 %v1957_v4, %v923_v2  ;;  %v1124_v6 = vpop.f32.mrb[27].mxu0  ;;  %v925_v8 = vld [vmem:[%s2802_s10 + $0x68] sm:$0xff]  ;;  %v924_v9 = vld [vmem:[%s2802_s10 + $0x60] sm:$0xff]  ;;  %v927_v14 = vld [vmem:[%s2802_s10 + $0x78] sm:$0xff] }
 0x281   : > { %v1163_v7 = vadd.f32 %v1124_v6, %v922_v3  ;;  %v1960_v10 = vpop.f32.mrb[28].mxu0  ;;  %v926_v15 = vld [vmem:[%s2802_s10 + $0x70] sm:$0xff]  ;;  %s1400_s23 = sshll.u32 %s2802_s10, 4  ;;  %s3355_s30 = sld [smem:[#allocation30_spill]]  ;;  %s3237_s23 = int_to_ptr.vmem [resolvable:$true] %s1400_s23 }
 0x282   : > { %1180 = vst [vmem:[%s2802_s10 + $0x58] sm:$0xff] %v1164_v5  ;;  %v1166_v11 = vadd.f32 %v1960_v10, %v925_v8  ;;  %v1134_v12 = vpop.f32.mrb[29].mxu0  ;;  %s2382_s0 = scalar_lea.vmem %s3237_s23, 2048  ;;  %s2533_s13 = smov [#allocation10]  }
 0x283   : > { %1179 = vst [vmem:[%s2802_s10 + $0x50] sm:$0xff] %v1163_v7  ;;  %v1165_v13 = vadd.f32 %v1134_v12, %v924_v9  ;;  %v1963_v16 = vpop.f32.mrb[30].mxu0  ;;  %p2383_p3 = scmp.ne.s32.totalorder %s3237_s23, %s2382_s0  ;;  %s2386_s28 = sshll.u32 %s2533_s13, 4  ;;  %s2387_s28 = int_to_ptr.vmem [resolvable:$false] %s2386_s28 }
 0x284   : > { %1182 = vst [vmem:[%s2802_s10 + $0x68] sm:$0xff] %v1166_v11  ;;  %v1168_v17 = vadd.f32 %v1963_v16, %v927_v14  ;;  %v1144_v18 = vpop.f32.mrb[31].mxu0  ;;  %s2388_s24 = scalar_lea.vmem %s2387_s28, 4096  ;;  %p2389_p10 = scmp.lt.s32.totalorder %s3237_s23, %s2387_s28 }
 0x285   : > { %1181 = vst [vmem:[%s2802_s10 + $0x60] sm:$0xff] %v1165_v13  ;;  %v1167_v19 = vadd.f32 %v1144_v18, %v926_v15  ;;  %p2384_p6 = pnand %p2383_p3, %p3351_p9  ;;  %p2390_p11 = scmp.lt.s32.totalorder %s2388_s24, %s2382_s0 }
 0x286   : > { %1184 = vst [vmem:[%s2802_s10 + $0x78] sm:$0xff] %v1168_v17 }
 0x287   : > { %s3356_s9 = smov %s3355_s30  ;;  %s3235_s25 = scalar_lea.hbm %s3355_s30, %s3040_s16  ;;  %1183 = vst [vmem:[%s2802_s10 + $0x70] sm:$0xff] %v1167_v19 }
 0x288   : > { %p2385_p1 = pneg %p2384_p6  ;;  %p2391_p12 = por %p2390_p11, %p2389_p10 }
 0x28a   : > { %p2392_p2 = pnand %p2391_p12, %p2385_p1 }
 0x28c   : > { %2395 = shalt.err (!%p2392_p2)
}
 0x28d   : > { %s2396_s10 = scalar_lea.hbm %s3235_s25, 2048  ;;  %s2400_s12 = scalar_lea.hbm %s3356_s9, 4096 }
 0x28e   : > { %p2397_p13 = scmp.ne.s32.totalorder %s3235_s25, %s2396_s10  ;;  %p2401_p8 = scmp.lt.u32.totalorder %s3235_s25, %s3356_s9 }
 0x28f   : > { %p2402_p5 = scmp.lt.u32.totalorder %s2400_s12, %s2396_s10  ;;  %p2404_p3 = scmp.lt.u32.totalorder %s2396_s10, %s3235_s25 }
 0x290   : > { %p2398_p0 = pnand %p2397_p13, %p3351_p9 }
 0x291   : > { %p2403_p7 = por %p2402_p5, %p2401_p8 }
 0x292   : > { %p2399_p4 = pneg %p2398_p0 }
 0x293   : > { %p2405_p6 = por %p2404_p3, %p2403_p7 }
 0x295   : > { %p2406_p1 = pnand %p2405_p6, %p2399_p4 }
 0x297   : > { %2409 = shalt.err (!%p2406_p1)
}
 0x298   : > { %2080 = dma.vmem_to_hbm [thread:$0]  (%p3351_p9), %s3237_s23, 2048, %s3235_s25, %s3087_s20, %s2528_s15, %s2528_s15, %s2529_s17  }
 0x299 PF: > { %p2112_p10 = scmp.ge.s32.totalorder %s2516_s7, 2  ;;  %s1441_s4 = sand.u32 1, %s2476_s21  }
 0x29a   : > { %p3357_p11 = scmp.ne.s32.totalorder %s3341_s19, 0  ;;  %s1442_s14 = scalar_lea.sflag [#allocation4], %s1441_s4 }
 0x29c   : > { %p2096_p12 = pnand %p2112_p10, %p3357_p11 }
 0x29e   : > { %2463 = dma.done.wait (!%p2096_p12), %s1442_s14, 2048  }
 0x29f   : > { %2465 = vsyncadd (!%p2096_p12), %s1442_s14, 4294965248  ;;  %s3358_s29 = sadd.s32 4294967294, %s2516_s7  }
 0x2a0   : > { %s1450_s11 = sand.u32 1, %s3358_s29  }
 0x2a1   : > { %s1451_s18 = scalar_lea.sflag [#allocation9], %s1450_s11 }
 0x2a2   : > { %2467 = dma.done.wait (!%p2096_p12), %s1451_s18, 4096  }
 0x2a3   : > { %2469 = vsyncadd (!%p2096_p12), %s1451_s18, 4294963200  ;;  %s1469_s27 = scalar_lea.sflag [#allocation12], %s1450_s11 }
 0x2a4   : > { %2471 = dma.done.wait (!%p2096_p12), %s1469_s27, 256  }
 0x2a5   : > { %2473 = vsyncadd (!%p2096_p12), %s1469_s27, 4294967040  ;;  %s32_s7 = sadd.s32 1, %s2516_s7   ;;  %s3359_s20 = sld [smem:[#allocation19_spill]] }
 0x2a6   : > { %p29_p9 = scmp.ge.s32.totalorder %s32_s7, 6   ;;  %s3360_s23 = sld [smem:[#allocation26_spill]] }
 0x2a7   : > { %s3361_s24 = sld [smem:[#allocation20_spill]]  ;;  %s3362_s25 = sld [smem:[#allocation21_spill]] }
 0x2a8   : > { %s3363_s26 = sld [smem:[#allocation27_spill]]  ;;  %s3364_s27 = sld [smem:[#allocation22_spill]] }
 0x2a9   : > { %s3365_s28 = sld [smem:[#allocation23_spill]]  ;;  %s3366_s29 = sld [smem:[#allocation24_spill]] }
 0x2aa   : > { %s3367_s30 = sld [smem:[#allocation25_spill]]  ;;  %s3368_s21 = smov %s2480_s22 }
 0x2ab   : > { %s3369_s22 = smov %s3359_s20  ;;  %31 = sbr.rel (!%p29_p9) target bundleno = 19 (0x13), region = 154 }
 0x2b2   :  { %1483 = vsyncpa [#allocation3], 1 }
 0x2b3   :  { %1485 = vsyncpa [#allocation3 + $0x1], 1 }
 0x2b4   :  { %1486 = vsyncpa [#allocation6], 1 }
 0x2b5   :  { %1488 = vsyncpa [#allocation6 + $0x1], 1 }
 0x2b6   :  { %1489 = vsyncpa [#allocation4], 1 }
 0x2b7   :  { %1491 = vsyncpa [#allocation4 + $0x1], 1 }
 0x2b8   :  { %1492 = vsyncpa [#allocation9], 1 }
 0x2b9   :  { %1494 = vsyncpa [#allocation9 + $0x1], 1 }
 0x2ba   :  { %1495 = vsyncpa [#allocation12], 1 }
 0x2bb   :  { %1497 = vsyncpa [#allocation12 + $0x1], 1 }

</bundles_post_ra>
